<compile_context>
chip_gen: v6e
topology: v6e:2x2x1
jax: 0.10.0
libtpu: 0.0.40
codegen_flags: <defaults>
</compile_context>

<pallas_src>
import jax
import jax.numpy as jnp
from jax.experimental import pallas as pl
from jax.experimental.pallas import tpu as pltpu


# ----------------------------------------------------------------------------
# Pallas kernel: time-blocked LSTM recurrence, h/c resident in VMEM scratch
# ----------------------------------------------------------------------------
def _make_lstm_block_kernel(tb, t_valid, needs_mask):
    """Build a kernel that runs `tb` unrolled LSTM steps per grid iteration."""

    def kernel(gx_ref, whh_ref, h0_ref, c0_ref, out_ref, hN_ref, cN_ref,
               h_sc, c_sc):
        blk = pl.program_id(0)

        @pl.when(blk == 0)
        def _():
            h_sc[...] = h0_ref[...]
            c_sc[...] = c0_ref[...]

        # Gate-major recurrent weights, loaded once per time block.
        w_i = whh_ref[0]
        w_f = whh_ref[1]
        w_g = whh_ref[2]
        w_o = whh_ref[3]

        h = h_sc[...]
        c = c_sc[...]

        # Tb is small & static -> fully unrolled inner loop; the recurrence is
        # carried in registers and spilled back to scratch once per block.
        for tt in range(tb):
            gx = gx_ref[tt]                       # (4, Bp, H) pre-projected x-gates (incl. bias)
            r_i = gx[0] + jnp.dot(h, w_i, preferred_element_type=jnp.float32)
            r_f = gx[1] + jnp.dot(h, w_f, preferred_element_type=jnp.float32)
            r_g = gx[2] + jnp.dot(h, w_g, preferred_element_type=jnp.float32)
            r_o = gx[3] + jnp.dot(h, w_o, preferred_element_type=jnp.float32)

            i_g = jax.nn.sigmoid(r_i)
            f_g = jax.nn.sigmoid(r_f)
            g_g = jnp.tanh(r_g)
            o_g = jax.nn.sigmoid(r_o)

            c_new = f_g * c + i_g * g_g
            h_new = o_g * jnp.tanh(c_new)

            if needs_mask:
                # Last block may contain padded time steps; hold the state.
                valid = (blk * tb + tt) < t_valid
                h_new = jnp.where(valid, h_new, h)
                c_new = jnp.where(valid, c_new, c)

            h, c = h_new, c_new
            out_ref[tt] = h_new.astype(out_ref.dtype)   # VMEM slab; one HBM store per block

        h_sc[...] = h
        c_sc[...] = c

        @pl.when(blk == pl.num_programs(0) - 1)
        def _():
            hN_ref[...] = h.astype(hN_ref.dtype)
            cN_ref[...] = c.astype(cN_ref.dtype)

    return kernel


def lstm_sequence_pallas(x, w_ih_t, w_hh_t, bias, h0, c0, *, time_block=32):
    """x: (T, B, N); w_ih_t: (N, 4H); w_hh_t: (H, 4H); bias: (1, 4H);
    h0, c0: (B, H).  Gate order [i, f, g, o] (torch.nn.LSTMCell).
    Returns (output (T, B, H), hN (B, H), cN (B, H))."""
    T, B, N = x.shape
    H = h0.shape[-1]
    dtype = jnp.float32

    # --- Padding: batch to 8 sublanes; time to a multiple of the time block.
    Bp = ((B + 7) // 8) * 8
    Tb = max(1, min(time_block, T))
    n_blk = (T + Tb - 1) // Tb
    Tp = n_blk * Tb
    needs_mask = (Tp != T)

    x_p = jnp.zeros((Tp, Bp, N), dtype).at[:T, :B].set(x.astype(dtype))
    h0_p = jnp.zeros((Bp, H), dtype).at[:B].set(h0.astype(dtype))
    c0_p = jnp.zeros((Bp, H), dtype).at[:B].set(c0.astype(dtype))

    # --- Hoisted input projection: one large matmul (M = Tp*Bp) + bias, then
    #     laid out gate-major (T, 4, B, H) so the kernel never lane-slices.
    gx = x_p.reshape(Tp * Bp, N) @ w_ih_t + bias            # (Tp*Bp, 4H)
    gx = gx.reshape(Tp, Bp, 4, H).transpose(0, 2, 1, 3)     # (Tp, 4, Bp, H)

    # Gate-major recurrent weights: (4, H, H).
    whh_g = w_hh_t.reshape(H, 4, H).transpose(1, 0, 2)

    kernel = _make_lstm_block_kernel(Tb, T, needs_mask)

    grid_spec = pltpu.PrefetchScalarGridSpec(
        num_scalar_prefetch=0,
        grid=(n_blk,),
        in_specs=[
            pl.BlockSpec((Tb, 4, Bp, H), lambda i: (i, 0, 0, 0)),   # gates_x block
            pl.BlockSpec((4, H, H), lambda i: (0, 0, 0)),           # W_hh (gate-major, resident)
            pl.BlockSpec((Bp, H), lambda i: (0, 0)),                # h0
            pl.BlockSpec((Bp, H), lambda i: (0, 0)),                # c0
        ],
        out_specs=[
            pl.BlockSpec((Tb, Bp, H), lambda i: (i, 0, 0)),         # output slab
            pl.BlockSpec((Bp, H), lambda i: (0, 0)),                # final h (resident)
            pl.BlockSpec((Bp, H), lambda i: (0, 0)),                # final c (resident)
        ],
        scratch_shapes=[
            pltpu.VMEM((Bp, H), jnp.float32),                       # h state
            pltpu.VMEM((Bp, H), jnp.float32),                       # c state
        ],
    )

    out_shapes = (
        jax.ShapeDtypeStruct((Tp, Bp, H), dtype),
        jax.ShapeDtypeStruct((Bp, H), dtype),
        jax.ShapeDtypeStruct((Bp, H), dtype),
    )

    # Rough VMEM budget (double-buffered pipeline blocks + scratch).  Explicit
    # limit so larger shapes stay resident past v5e's 16 MiB default scoped
    # limit while staying well inside v7x's 64 MiB physical VMEM.
    bytes_f32 = 4
    est = (2 * Tb * 4 * Bp * H          # gates_x blocks (double-buffered)
           + 2 * 4 * H * H              # W_hh
           + 2 * Tb * Bp * H            # output slab
           + 8 * Bp * H) * bytes_f32    # h0/c0/hN/cN/scratch
    vmem_limit = int(min(max(4 * est, 16 << 20), 48 << 20))

    cost = pl.CostEstimate(
        flops=int(2 * Tp * Bp * H * 4 * H + 10 * Tp * Bp * H),
        transcendentals=int(5 * Tp * Bp * H),
        bytes_accessed=int((gx.size + Tp * Bp * H + 4 * H * H + 8 * Bp * H)
                           * bytes_f32),
    )

    out, hN, cN = pl.pallas_call(
        kernel,
        out_shape=out_shapes,
        grid_spec=grid_spec,
        compiler_params=pltpu.CompilerParams(
            dimension_semantics=("arbitrary",),   # time recurrence is serial
            vmem_limit_bytes=vmem_limit,
        ),
        cost_estimate=cost,
    )(gx, whh_g, h0_p, c0_p)

    return out[:T, :B], hN[:B], cN[:B]


# ----------------------------------------------------------------------------
# MogrifierRNN module (JAX side): parameter construction + forward wrapper
# ----------------------------------------------------------------------------
class MogrifierRNNPallas:
    def __init__(self, input_size, hidden_size, n_mogrifying, key):
        self.n = input_size
        self.m = hidden_size
        self.n_mogrifying = n_mogrifying
        self.k = max(20, min(self.m, self.n) // 16)
        self.deal_tuple_hidden = True  # LSTMCell

        keys = jax.random.split(key, 16)
        kit = iter(keys)

        def xavier(shape, k_):
            fan_in, fan_out = shape[0], shape[1]
            bound = (6.0 / (fan_in + fan_out)) ** 0.5
            return jax.random.uniform(k_, shape, jnp.float32, -bound, bound)

        # --- LSTMCell parameters (torch.nn.LSTMCell init: U(-1/sqrt(H), 1/sqrt(H))) ---
        bound = 1.0 / (self.m ** 0.5)
        u = lambda shape, k_: jax.random.uniform(k_, shape, jnp.float32, -bound, bound)
        # stored transposed for the kernel: (N, 4H), (H, 4H); gate order [i,f,g,o]
        self.w_ih_t = u((self.n, 4 * self.m), next(kit))
        self.w_hh_t = u((self.m, 4 * self.m), next(kit))
        b_ih = u((4 * self.m,), next(kit))
        b_hh = u((4 * self.m,), next(kit))
        self.bias = (b_ih + b_hh).reshape(1, 4 * self.m)

        # --- Mogrifier parameters (shapes per reference __init__; unused in forward) ---
        self.Q_left = [xavier((self.m, self.k), next(kit))
                       for _ in range(1, n_mogrifying, 2)]
        self.Q_right = [xavier((self.k, self.n), next(kit))
                        for _ in range(1, n_mogrifying, 2)]
        self.R_left = [xavier((self.n, self.k), next(kit))
                       for _ in range(2, n_mogrifying, 2)]
        self.R_right = [xavier((self.k, self.m), next(kit))
                        for _ in range(2, n_mogrifying, 2)]

    def forward(self, x, hidden=None):
        # x: (seq_len, batch, input_size)
        seq_len, batch_size, _ = x.shape
        if hidden is None:
            h0 = jnp.zeros((batch_size, self.m), jnp.float32)
            c0 = jnp.zeros((batch_size, self.m), jnp.float32)
        else:
            h0, c0 = hidden
            h0 = h0.reshape(batch_size, self.m)
            c0 = c0.reshape(batch_size, self.m)

        output, hN, cN = lstm_sequence_pallas(
            x, self.w_ih_t, self.w_hh_t, self.bias, h0, c0)
        # match PyTorch return: hidden states with a leading singleton dim
        return output, (hN[None, ...], cN[None, ...])


# ----------------------------------------------------------------------------
# Pure-JAX reference (for correctness check against the kernel)
# ----------------------------------------------------------------------------
def lstm_sequence_ref(x, w_ih_t, w_hh_t, bias, h0, c0):
    H = h0.shape[-1]

    def step(carry, x_t):
        h, c = carry
        gates = x_t @ w_ih_t + h @ w_hh_t + bias
        i = jax.nn.sigmoid(gates[:, 0 * H:1 * H])
        f = jax.nn.sigmoid(gates[:, 1 * H:2 * H])
        g = jnp.tanh(gates[:, 2 * H:3 * H])
        o = jax.nn.sigmoid(gates[:, 3 * H:4 * H])
        c_new = f * c + i * g
        h_new = o * jnp.tanh(c_new)
        return (h_new, c_new), h_new

    (hN, cN), outs = jax.lax.scan(step, (h0, c0), x)
    return outs, hN, cN


if __name__ == "__main__":
    key = jax.random.PRNGKey(0)
    k_param, k_x = jax.random.split(key)

    seq_len, batch, input_size, hidden_size = 8, 2, 32, 32
    model = MogrifierRNNPallas(input_size, hidden_size, n_mogrifying=5, key=k_param)

    x = jax.random.normal(k_x, (seq_len, batch, input_size), jnp.float32)

    output, (hN, cN) = model.forward(x)
    jax.block_until_ready((output, hN, cN))

    # sanity check vs pure-JAX reference
    out_ref, hN_ref, cN_ref = lstm_sequence_ref(
        x, model.w_ih_t, model.w_hh_t, model.bias,
        jnp.zeros((batch, hidden_size)), jnp.zeros((batch, hidden_size)))
    assert output.shape == (seq_len, batch, hidden_size)
    assert hN.shape == (1, batch, hidden_size) and cN.shape == (1, batch, hidden_size)
    assert jnp.allclose(output, out_ref, atol=1e-5, rtol=1e-5)
    assert jnp.allclose(hN[0], hN_ref, atol=1e-5, rtol=1e-5)
    assert jnp.allclose(cN[0], cN_ref, atol=1e-5, rtol=1e-5)

    # also exercise the time-block remainder (masking) path: Tb=3 does not
    # divide T=8, so the last block is padded and masked inside the kernel.
    out2, h2, c2 = lstm_sequence_pallas(
        x, model.w_ih_t, model.w_hh_t, model.bias,
        jnp.zeros((batch, hidden_size)), jnp.zeros((batch, hidden_size)),
        time_block=3)
    jax.block_until_ready((out2, h2, c2))
    assert jnp.allclose(out2, out_ref, atol=1e-5, rtol=1e-5)
    assert jnp.allclose(h2, hN_ref, atol=1e-5, rtol=1e-5)
    assert jnp.allclose(c2, cN_ref, atol=1e-5, rtol=1e-5)

    print("KERNEL_OK")
</pallas_src>

<mosaic_0001>
module attributes {stable_mosaic.version = 11 : i64} {
  func.func @kernel(%arg0: i32, %arg1: memref<8x4x8x32xf32, #tpu.memory_space<vmem>>, %arg2: memref<4x32x32xf32, #tpu.memory_space<vmem>>, %arg3: memref<8x32xf32, #tpu.memory_space<vmem>>, %arg4: memref<8x32xf32, #tpu.memory_space<vmem>>, %arg5: memref<8x8x32xf32, #tpu.memory_space<vmem>>, %arg6: memref<8x32xf32, #tpu.memory_space<vmem>>, %arg7: memref<8x32xf32, #tpu.memory_space<vmem>>, %arg8: memref<8x32xf32, #tpu.memory_space<vmem>>, %arg9: memref<8x32xf32, #tpu.memory_space<vmem>>) attributes {dimension_semantics = [#tpu.dimension_semantics<arbitrary>], iteration_bounds = array<i64: 1>, scalar_prefetch = 0 : i64, scratch_operands = 2 : i64, tpu.core_type = #tpu.core_type<tc>, window_params = [{transform_indices = @transform_0, window_bounds = array<i64: 8, 4, 8, 32>}, {pipeline_mode = #tpu.pipeline_mode<synchronous>, transform_indices = @transform_1, window_bounds = array<i64: 4, 32, 32>}, {pipeline_mode = #tpu.pipeline_mode<synchronous>, transform_indices = @transform_2, window_bounds = array<i64: 8, 32>}, {pipeline_mode = #tpu.pipeline_mode<synchronous>, transform_indices = @transform_3, window_bounds = array<i64: 8, 32>}, {transform_indices = @transform_4, window_bounds = array<i64: 8, 8, 32>}, {pipeline_mode = #tpu.pipeline_mode<synchronous>, transform_indices = @transform_5, window_bounds = array<i64: 8, 32>}, {pipeline_mode = #tpu.pipeline_mode<synchronous>, transform_indices = @transform_6, window_bounds = array<i64: 8, 32>}]} {
    %c0_i32 = arith.constant 0 : i32
    %0 = arith.cmpi eq, %arg0, %c0_i32 : i32
    %1 = arith.extui %0 : i1 to i32
    %c0_i32_0 = arith.constant 0 : i32
    %2 = arith.cmpi ne, %1, %c0_i32_0 : i32
    scf.if %2 {
      %c0_126 = arith.constant 0 : index
      %c0_127 = arith.constant 0 : index
      %354 = vector.load %arg3[%c0_126, %c0_127] : memref<8x32xf32, #tpu.memory_space<vmem>>, vector<8x32xf32>
      %c0_128 = arith.constant 0 : index
      %c0_129 = arith.constant 0 : index
      %355 = vector.load %arg8[%c0_128, %c0_129] : memref<8x32xf32, #tpu.memory_space<vmem>>, vector<8x32xf32>
      tpu.vector_store %arg8[%c0_128, %c0_129], %354 {strides = array<i32>} : memref<8x32xf32, #tpu.memory_space<vmem>>, vector<8x32xf32>,
      %c0_130 = arith.constant 0 : index
      %c0_131 = arith.constant 0 : index
      %356 = vector.load %arg4[%c0_130, %c0_131] : memref<8x32xf32, #tpu.memory_space<vmem>>, vector<8x32xf32>
      %c0_132 = arith.constant 0 : index
      %c0_133 = arith.constant 0 : index
      %357 = vector.load %arg9[%c0_132, %c0_133] : memref<8x32xf32, #tpu.memory_space<vmem>>, vector<8x32xf32>
      tpu.vector_store %arg9[%c0_132, %c0_133], %356 {strides = array<i32>} : memref<8x32xf32, #tpu.memory_space<vmem>>, vector<8x32xf32>,
    } else {
    }
    %c0 = arith.constant 0 : index
    %c0_1 = arith.constant 0 : index
    %c0_2 = arith.constant 0 : index
    %3 = vector.load %arg2[%c0, %c0_1, %c0_2] : memref<4x32x32xf32, #tpu.memory_space<vmem>>, vector<1x32x32xf32>
    %4 = vector.shape_cast %3 : vector<1x32x32xf32> to vector<32x32xf32>
    %c1 = arith.constant 1 : index
    %c0_3 = arith.constant 0 : index
    %c0_4 = arith.constant 0 : index
    %5 = vector.load %arg2[%c1, %c0_3, %c0_4] : memref<4x32x32xf32, #tpu.memory_space<vmem>>, vector<1x32x32xf32>
    %6 = vector.shape_cast %5 : vector<1x32x32xf32> to vector<32x32xf32>
    %c2 = arith.constant 2 : index
    %c0_5 = arith.constant 0 : index
    %c0_6 = arith.constant 0 : index
    %7 = vector.load %arg2[%c2, %c0_5, %c0_6] : memref<4x32x32xf32, #tpu.memory_space<vmem>>, vector<1x32x32xf32>
    %8 = vector.shape_cast %7 : vector<1x32x32xf32> to vector<32x32xf32>
    %c3 = arith.constant 3 : index
    %c0_7 = arith.constant 0 : index
    %c0_8 = arith.constant 0 : index
    %9 = vector.load %arg2[%c3, %c0_7, %c0_8] : memref<4x32x32xf32, #tpu.memory_space<vmem>>, vector<1x32x32xf32>
    %10 = vector.shape_cast %9 : vector<1x32x32xf32> to vector<32x32xf32>
    %c0_9 = arith.constant 0 : index
    %c0_10 = arith.constant 0 : index
    %11 = vector.load %arg8[%c0_9, %c0_10] : memref<8x32xf32, #tpu.memory_space<vmem>>, vector<8x32xf32>
    %c0_11 = arith.constant 0 : index
    %c0_12 = arith.constant 0 : index
    %12 = vector.load %arg9[%c0_11, %c0_12] : memref<8x32xf32, #tpu.memory_space<vmem>>, vector<8x32xf32>
    %c0_13 = arith.constant 0 : index
    %c0_14 = arith.constant 0 : index
    %c0_15 = arith.constant 0 : index
    %c0_16 = arith.constant 0 : index
    %13 = vector.load %arg1[%c0_13, %c0_14, %c0_15, %c0_16] : memref<8x4x8x32xf32, #tpu.memory_space<vmem>>, vector<1x4x8x32xf32>
    %14 = vector.shape_cast %13 : vector<1x4x8x32xf32> to vector<4x8x32xf32>
    %15 = vector.extract_strided_slice %14 {offsets = [0, 0, 0], sizes = [1, 8, 32], strides = [1, 1, 1]} : vector<4x8x32xf32> to vector<1x8x32xf32>
    %16 = vector.shape_cast %15 : vector<1x8x32xf32> to vector<8x32xf32>
    %cst = arith.constant dense<0.000000e+00> : vector<8x32xf32>
    %17 = tpu.matmul %11, %4, %cst {dimension_numbers = #tpu.dot_dimension_numbers<[1], [0], [0], [1], [0, 0, 1, 1], [], []>} : vector<8x32xf32>, vector<32x32xf32>, vector<8x32xf32> -> vector<8x32xf32>
    %18 = arith.addf %16, %17 : vector<8x32xf32>
    %19 = vector.extract_strided_slice %14 {offsets = [1, 0, 0], sizes = [1, 8, 32], strides = [1, 1, 1]} : vector<4x8x32xf32> to vector<1x8x32xf32>
    %20 = vector.shape_cast %19 : vector<1x8x32xf32> to vector<8x32xf32>
    %cst_17 = arith.constant dense<0.000000e+00> : vector<8x32xf32>
    %21 = tpu.matmul %11, %6, %cst_17 {dimension_numbers = #tpu.dot_dimension_numbers<[1], [0], [0], [1], [0, 0, 1, 1], [], []>} : vector<8x32xf32>, vector<32x32xf32>, vector<8x32xf32> -> vector<8x32xf32>
    %22 = arith.addf %20, %21 : vector<8x32xf32>
    %23 = vector.extract_strided_slice %14 {offsets = [2, 0, 0], sizes = [1, 8, 32], strides = [1, 1, 1]} : vector<4x8x32xf32> to vector<1x8x32xf32>
    %24 = vector.shape_cast %23 : vector<1x8x32xf32> to vector<8x32xf32>
    %cst_18 = arith.constant dense<0.000000e+00> : vector<8x32xf32>
    %25 = tpu.matmul %11, %8, %cst_18 {dimension_numbers = #tpu.dot_dimension_numbers<[1], [0], [0], [1], [0, 0, 1, 1], [], []>} : vector<8x32xf32>, vector<32x32xf32>, vector<8x32xf32> -> vector<8x32xf32>
    %26 = arith.addf %24, %25 : vector<8x32xf32>
    %27 = vector.extract_strided_slice %14 {offsets = [3, 0, 0], sizes = [1, 8, 32], strides = [1, 1, 1]} : vector<4x8x32xf32> to vector<1x8x32xf32>
    %28 = vector.shape_cast %27 : vector<1x8x32xf32> to vector<8x32xf32>
    %cst_19 = arith.constant dense<0.000000e+00> : vector<8x32xf32>
    %29 = tpu.matmul %11, %10, %cst_19 {dimension_numbers = #tpu.dot_dimension_numbers<[1], [0], [0], [1], [0, 0, 1, 1], [], []>} : vector<8x32xf32>, vector<32x32xf32>, vector<8x32xf32> -> vector<8x32xf32>
    %30 = arith.addf %28, %29 : vector<8x32xf32>
    %31 = arith.negf %18 : vector<8x32xf32>
    %32 = math.exp %31 : vector<8x32xf32>
    %cst_20 = arith.constant 1.000000e+00 : f32
    %33 = vector.broadcast %cst_20 : f32 to vector<8x32xf32>
    %34 = arith.addf %33, %32 : vector<8x32xf32>
    %35 = arith.divf %33, %34 : vector<8x32xf32>
    %36 = arith.negf %22 : vector<8x32xf32>
    %37 = math.exp %36 : vector<8x32xf32>
    %cst_21 = arith.constant 1.000000e+00 : f32
    %38 = vector.broadcast %cst_21 : f32 to vector<8x32xf32>
    %39 = arith.addf %38, %37 : vector<8x32xf32>
    %40 = arith.divf %38, %39 : vector<8x32xf32>
    %41 = math.tanh %26 : vector<8x32xf32>
    %42 = arith.negf %30 : vector<8x32xf32>
    %43 = math.exp %42 : vector<8x32xf32>
    %cst_22 = arith.constant 1.000000e+00 : f32
    %44 = vector.broadcast %cst_22 : f32 to vector<8x32xf32>
    %45 = arith.addf %44, %43 : vector<8x32xf32>
    %46 = arith.divf %44, %45 : vector<8x32xf32>
    %47 = arith.mulf %40, %12 : vector<8x32xf32>
    %48 = arith.mulf %35, %41 : vector<8x32xf32>
    %49 = arith.addf %47, %48 : vector<8x32xf32>
    %50 = math.tanh %49 : vector<8x32xf32>
    %51 = arith.mulf %46, %50 : vector<8x32xf32>
    %c0_23 = arith.constant 0 : index
    %c0_24 = arith.constant 0 : index
    %c0_25 = arith.constant 0 : index
    %52 = vector.load %arg5[%c0_23, %c0_24, %c0_25] : memref<8x8x32xf32, #tpu.memory_space<vmem>>, vector<1x8x32xf32>
    %53 = vector.shape_cast %52 : vector<1x8x32xf32> to vector<8x32xf32>
    %54 = vector.shape_cast %51 : vector<8x32xf32> to vector<1x8x32xf32>
    tpu.vector_store %arg5[%c0_23, %c0_24, %c0_25], %54 {strides = array<i32>} : memref<8x8x32xf32, #tpu.memory_space<vmem>>, vector<1x8x32xf32>,
    %c1_26 = arith.constant 1 : index
    %c0_27 = arith.constant 0 : index
    %c0_28 = arith.constant 0 : index
    %c0_29 = arith.constant 0 : index
    %55 = vector.load %arg1[%c1_26, %c0_27, %c0_28, %c0_29] : memref<8x4x8x32xf32, #tpu.memory_space<vmem>>, vector<1x4x8x32xf32>
    %56 = vector.shape_cast %55 : vector<1x4x8x32xf32> to vector<4x8x32xf32>
    %57 = vector.extract_strided_slice %56 {offsets = [0, 0, 0], sizes = [1, 8, 32], strides = [1, 1, 1]} : vector<4x8x32xf32> to vector<1x8x32xf32>
    %58 = vector.shape_cast %57 : vector<1x8x32xf32> to vector<8x32xf32>
    %cst_30 = arith.constant dense<0.000000e+00> : vector<8x32xf32>
    %59 = tpu.matmul %51, %4, %cst_30 {dimension_numbers = #tpu.dot_dimension_numbers<[1], [0], [0], [1], [0, 0, 1, 1], [], []>} : vector<8x32xf32>, vector<32x32xf32>, vector<8x32xf32> -> vector<8x32xf32>
    %60 = arith.addf %58, %59 : vector<8x32xf32>
    %61 = vector.extract_strided_slice %56 {offsets = [1, 0, 0], sizes = [1, 8, 32], strides = [1, 1, 1]} : vector<4x8x32xf32> to vector<1x8x32xf32>
    %62 = vector.shape_cast %61 : vector<1x8x32xf32> to vector<8x32xf32>
    %cst_31 = arith.constant dense<0.000000e+00> : vector<8x32xf32>
    %63 = tpu.matmul %51, %6, %cst_31 {dimension_numbers = #tpu.dot_dimension_numbers<[1], [0], [0], [1], [0, 0, 1, 1], [], []>} : vector<8x32xf32>, vector<32x32xf32>, vector<8x32xf32> -> vector<8x32xf32>
    %64 = arith.addf %62, %63 : vector<8x32xf32>
    %65 = vector.extract_strided_slice %56 {offsets = [2, 0, 0], sizes = [1, 8, 32], strides = [1, 1, 1]} : vector<4x8x32xf32> to vector<1x8x32xf32>
    %66 = vector.shape_cast %65 : vector<1x8x32xf32> to vector<8x32xf32>
    %cst_32 = arith.constant dense<0.000000e+00> : vector<8x32xf32>
    %67 = tpu.matmul %51, %8, %cst_32 {dimension_numbers = #tpu.dot_dimension_numbers<[1], [0], [0], [1], [0, 0, 1, 1], [], []>} : vector<8x32xf32>, vector<32x32xf32>, vector<8x32xf32> -> vector<8x32xf32>
    %68 = arith.addf %66, %67 : vector<8x32xf32>
    %69 = vector.extract_strided_slice %56 {offsets = [3, 0, 0], sizes = [1, 8, 32], strides = [1, 1, 1]} : vector<4x8x32xf32> to vector<1x8x32xf32>
    %70 = vector.shape_cast %69 : vector<1x8x32xf32> to vector<8x32xf32>
    %cst_33 = arith.constant dense<0.000000e+00> : vector<8x32xf32>
    %71 = tpu.matmul %51, %10, %cst_33 {dimension_numbers = #tpu.dot_dimension_numbers<[1], [0], [0], [1], [0, 0, 1, 1], [], []>} : vector<8x32xf32>, vector<32x32xf32>, vector<8x32xf32> -> vector<8x32xf32>
    %72 = arith.addf %70, %71 : vector<8x32xf32>
    %73 = arith.negf %60 : vector<8x32xf32>
    %74 = math.exp %73 : vector<8x32xf32>
    %cst_34 = arith.constant 1.000000e+00 : f32
    %75 = vector.broadcast %cst_34 : f32 to vector<8x32xf32>
    %76 = arith.addf %75, %74 : vector<8x32xf32>
    %77 = arith.divf %75, %76 : vector<8x32xf32>
    %78 = arith.negf %64 : vector<8x32xf32>
    %79 = math.exp %78 : vector<8x32xf32>
    %cst_35 = arith.constant 1.000000e+00 : f32
    %80 = vector.broadcast %cst_35 : f32 to vector<8x32xf32>
    %81 = arith.addf %80, %79 : vector<8x32xf32>
    %82 = arith.divf %80, %81 : vector<8x32xf32>
    %83 = math.tanh %68 : vector<8x32xf32>
    %84 = arith.negf %72 : vector<8x32xf32>
    %85 = math.exp %84 : vector<8x32xf32>
    %cst_36 = arith.constant 1.000000e+00 : f32
    %86 = vector.broadcast %cst_36 : f32 to vector<8x32xf32>
    %87 = arith.addf %86, %85 : vector<8x32xf32>
    %88 = arith.divf %86, %87 : vector<8x32xf32>
    %89 = arith.mulf %82, %49 : vector<8x32xf32>
    %90 = arith.mulf %77, %83 : vector<8x32xf32>
    %91 = arith.addf %89, %90 : vector<8x32xf32>
    %92 = math.tanh %91 : vector<8x32xf32>
    %93 = arith.mulf %88, %92 : vector<8x32xf32>
    %c1_37 = arith.constant 1 : index
    %c0_38 = arith.constant 0 : index
    %c0_39 = arith.constant 0 : index
    %94 = vector.load %arg5[%c1_37, %c0_38, %c0_39] : memref<8x8x32xf32, #tpu.memory_space<vmem>>, vector<1x8x32xf32>
    %95 = vector.shape_cast %94 : vector<1x8x32xf32> to vector<8x32xf32>
    %96 = vector.shape_cast %93 : vector<8x32xf32> to vector<1x8x32xf32>
    tpu.vector_store %arg5[%c1_37, %c0_38, %c0_39], %96 {strides = array<i32>} : memref<8x8x32xf32, #tpu.memory_space<vmem>>, vector<1x8x32xf32>,
    %c2_40 = arith.constant 2 : index
    %c0_41 = arith.constant 0 : index
    %c0_42 = arith.constant 0 : index
    %c0_43 = arith.constant 0 : index
    %97 = vector.load %arg1[%c2_40, %c0_41, %c0_42, %c0_43] : memref<8x4x8x32xf32, #tpu.memory_space<vmem>>, vector<1x4x8x32xf32>
    %98 = vector.shape_cast %97 : vector<1x4x8x32xf32> to vector<4x8x32xf32>
    %99 = vector.extract_strided_slice %98 {offsets = [0, 0, 0], sizes = [1, 8, 32], strides = [1, 1, 1]} : vector<4x8x32xf32> to vector<1x8x32xf32>
    %100 = vector.shape_cast %99 : vector<1x8x32xf32> to vector<8x32xf32>
    %cst_44 = arith.constant dense<0.000000e+00> : vector<8x32xf32>
    %101 = tpu.matmul %93, %4, %cst_44 {dimension_numbers = #tpu.dot_dimension_numbers<[1], [0], [0], [1], [0, 0, 1, 1], [], []>} : vector<8x32xf32>, vector<32x32xf32>, vector<8x32xf32> -> vector<8x32xf32>
    %102 = arith.addf %100, %101 : vector<8x32xf32>
    %103 = vector.extract_strided_slice %98 {offsets = [1, 0, 0], sizes = [1, 8, 32], strides = [1, 1, 1]} : vector<4x8x32xf32> to vector<1x8x32xf32>
    %104 = vector.shape_cast %103 : vector<1x8x32xf32> to vector<8x32xf32>
    %cst_45 = arith.constant dense<0.000000e+00> : vector<8x32xf32>
    %105 = tpu.matmul %93, %6, %cst_45 {dimension_numbers = #tpu.dot_dimension_numbers<[1], [0], [0], [1], [0, 0, 1, 1], [], []>} : vector<8x32xf32>, vector<32x32xf32>, vector<8x32xf32> -> vector<8x32xf32>
    %106 = arith.addf %104, %105 : vector<8x32xf32>
    %107 = vector.extract_strided_slice %98 {offsets = [2, 0, 0], sizes = [1, 8, 32], strides = [1, 1, 1]} : vector<4x8x32xf32> to vector<1x8x32xf32>
    %108 = vector.shape_cast %107 : vector<1x8x32xf32> to vector<8x32xf32>
    %cst_46 = arith.constant dense<0.000000e+00> : vector<8x32xf32>
    %109 = tpu.matmul %93, %8, %cst_46 {dimension_numbers = #tpu.dot_dimension_numbers<[1], [0], [0], [1], [0, 0, 1, 1], [], []>} : vector<8x32xf32>, vector<32x32xf32>, vector<8x32xf32> -> vector<8x32xf32>
    %110 = arith.addf %108, %109 : vector<8x32xf32>
    %111 = vector.extract_strided_slice %98 {offsets = [3, 0, 0], sizes = [1, 8, 32], strides = [1, 1, 1]} : vector<4x8x32xf32> to vector<1x8x32xf32>
    %112 = vector.shape_cast %111 : vector<1x8x32xf32> to vector<8x32xf32>
    %cst_47 = arith.constant dense<0.000000e+00> : vector<8x32xf32>
    %113 = tpu.matmul %93, %10, %cst_47 {dimension_numbers = #tpu.dot_dimension_numbers<[1], [0], [0], [1], [0, 0, 1, 1], [], []>} : vector<8x32xf32>, vector<32x32xf32>, vector<8x32xf32> -> vector<8x32xf32>
    %114 = arith.addf %112, %113 : vector<8x32xf32>
    %115 = arith.negf %102 : vector<8x32xf32>
    %116 = math.exp %115 : vector<8x32xf32>
    %cst_48 = arith.constant 1.000000e+00 : f32
    %117 = vector.broadcast %cst_48 : f32 to vector<8x32xf32>
    %118 = arith.addf %117, %116 : vector<8x32xf32>
    %119 = arith.divf %117, %118 : vector<8x32xf32>
    %120 = arith.negf %106 : vector<8x32xf32>
    %121 = math.exp %120 : vector<8x32xf32>
    %cst_49 = arith.constant 1.000000e+00 : f32
    %122 = vector.broadcast %cst_49 : f32 to vector<8x32xf32>
    %123 = arith.addf %122, %121 : vector<8x32xf32>
    %124 = arith.divf %122, %123 : vector<8x32xf32>
    %125 = math.tanh %110 : vector<8x32xf32>
    %126 = arith.negf %114 : vector<8x32xf32>
    %127 = math.exp %126 : vector<8x32xf32>
    %cst_50 = arith.constant 1.000000e+00 : f32
    %128 = vector.broadcast %cst_50 : f32 to vector<8x32xf32>
    %129 = arith.addf %128, %127 : vector<8x32xf32>
    %130 = arith.divf %128, %129 : vector<8x32xf32>
    %131 = arith.mulf %124, %91 : vector<8x32xf32>
    %132 = arith.mulf %119, %125 : vector<8x32xf32>
    %133 = arith.addf %131, %132 : vector<8x32xf32>
    %134 = math.tanh %133 : vector<8x32xf32>
    %135 = arith.mulf %130, %134 : vector<8x32xf32>
    %c2_51 = arith.constant 2 : index
    %c0_52 = arith.constant 0 : index
    %c0_53 = arith.constant 0 : index
    %136 = vector.load %arg5[%c2_51, %c0_52, %c0_53] : memref<8x8x32xf32, #tpu.memory_space<vmem>>, vector<1x8x32xf32>
    %137 = vector.shape_cast %136 : vector<1x8x32xf32> to vector<8x32xf32>
    %138 = vector.shape_cast %135 : vector<8x32xf32> to vector<1x8x32xf32>
    tpu.vector_store %arg5[%c2_51, %c0_52, %c0_53], %138 {strides = array<i32>} : memref<8x8x32xf32, #tpu.memory_space<vmem>>, vector<1x8x32xf32>,
    %c3_54 = arith.constant 3 : index
    %c0_55 = arith.constant 0 : index
    %c0_56 = arith.constant 0 : index
    %c0_57 = arith.constant 0 : index
    %139 = vector.load %arg1[%c3_54, %c0_55, %c0_56, %c0_57] : memref<8x4x8x32xf32, #tpu.memory_space<vmem>>, vector<1x4x8x32xf32>
    %140 = vector.shape_cast %139 : vector<1x4x8x32xf32> to vector<4x8x32xf32>
    %141 = vector.extract_strided_slice %140 {offsets = [0, 0, 0], sizes = [1, 8, 32], strides = [1, 1, 1]} : vector<4x8x32xf32> to vector<1x8x32xf32>
    %142 = vector.shape_cast %141 : vector<1x8x32xf32> to vector<8x32xf32>
    %cst_58 = arith.constant dense<0.000000e+00> : vector<8x32xf32>
    %143 = tpu.matmul %135, %4, %cst_58 {dimension_numbers = #tpu.dot_dimension_numbers<[1], [0], [0], [1], [0, 0, 1, 1], [], []>} : vector<8x32xf32>, vector<32x32xf32>, vector<8x32xf32> -> vector<8x32xf32>
    %144 = arith.addf %142, %143 : vector<8x32xf32>
    %145 = vector.extract_strided_slice %140 {offsets = [1, 0, 0], sizes = [1, 8, 32], strides = [1, 1, 1]} : vector<4x8x32xf32> to vector<1x8x32xf32>
    %146 = vector.shape_cast %145 : vector<1x8x32xf32> to vector<8x32xf32>
    %cst_59 = arith.constant dense<0.000000e+00> : vector<8x32xf32>
    %147 = tpu.matmul %135, %6, %cst_59 {dimension_numbers = #tpu.dot_dimension_numbers<[1], [0], [0], [1], [0, 0, 1, 1], [], []>} : vector<8x32xf32>, vector<32x32xf32>, vector<8x32xf32> -> vector<8x32xf32>
    %148 = arith.addf %146, %147 : vector<8x32xf32>
    %149 = vector.extract_strided_slice %140 {offsets = [2, 0, 0], sizes = [1, 8, 32], strides = [1, 1, 1]} : vector<4x8x32xf32> to vector<1x8x32xf32>
    %150 = vector.shape_cast %149 : vector<1x8x32xf32> to vector<8x32xf32>
    %cst_60 = arith.constant dense<0.000000e+00> : vector<8x32xf32>
    %151 = tpu.matmul %135, %8, %cst_60 {dimension_numbers = #tpu.dot_dimension_numbers<[1], [0], [0], [1], [0, 0, 1, 1], [], []>} : vector<8x32xf32>, vector<32x32xf32>, vector<8x32xf32> -> vector<8x32xf32>
    %152 = arith.addf %150, %151 : vector<8x32xf32>
    %153 = vector.extract_strided_slice %140 {offsets = [3, 0, 0], sizes = [1, 8, 32], strides = [1, 1, 1]} : vector<4x8x32xf32> to vector<1x8x32xf32>
    %154 = vector.shape_cast %153 : vector<1x8x32xf32> to vector<8x32xf32>
    %cst_61 = arith.constant dense<0.000000e+00> : vector<8x32xf32>
    %155 = tpu.matmul %135, %10, %cst_61 {dimension_numbers = #tpu.dot_dimension_numbers<[1], [0], [0], [1], [0, 0, 1, 1], [], []>} : vector<8x32xf32>, vector<32x32xf32>, vector<8x32xf32> -> vector<8x32xf32>
    %156 = arith.addf %154, %155 : vector<8x32xf32>
    %157 = arith.negf %144 : vector<8x32xf32>
    %158 = math.exp %157 : vector<8x32xf32>
    %cst_62 = arith.constant 1.000000e+00 : f32
    %159 = vector.broadcast %cst_62 : f32 to vector<8x32xf32>
    %160 = arith.addf %159, %158 : vector<8x32xf32>
    %161 = arith.divf %159, %160 : vector<8x32xf32>
    %162 = arith.negf %148 : vector<8x32xf32>
    %163 = math.exp %162 : vector<8x32xf32>
    %cst_63 = arith.constant 1.000000e+00 : f32
    %164 = vector.broadcast %cst_63 : f32 to vector<8x32xf32>
    %165 = arith.addf %164, %163 : vector<8x32xf32>
    %166 = arith.divf %164, %165 : vector<8x32xf32>
    %167 = math.tanh %152 : vector<8x32xf32>
    %168 = arith.negf %156 : vector<8x32xf32>
    %169 = math.exp %168 : vector<8x32xf32>
    %cst_64 = arith.constant 1.000000e+00 : f32
    %170 = vector.broadcast %cst_64 : f32 to vector<8x32xf32>
    %171 = arith.addf %170, %169 : vector<8x32xf32>
    %172 = arith.divf %170, %171 : vector<8x32xf32>
    %173 = arith.mulf %166, %133 : vector<8x32xf32>
    %174 = arith.mulf %161, %167 : vector<8x32xf32>
    %175 = arith.addf %173, %174 : vector<8x32xf32>
    %176 = math.tanh %175 : vector<8x32xf32>
    %177 = arith.mulf %172, %176 : vector<8x32xf32>
    %c3_65 = arith.constant 3 : index
    %c0_66 = arith.constant 0 : index
    %c0_67 = arith.constant 0 : index
    %178 = vector.load %arg5[%c3_65, %c0_66, %c0_67] : memref<8x8x32xf32, #tpu.memory_space<vmem>>, vector<1x8x32xf32>
    %179 = vector.shape_cast %178 : vector<1x8x32xf32> to vector<8x32xf32>
    %180 = vector.shape_cast %177 : vector<8x32xf32> to vector<1x8x32xf32>
    tpu.vector_store %arg5[%c3_65, %c0_66, %c0_67], %180 {strides = array<i32>} : memref<8x8x32xf32, #tpu.memory_space<vmem>>, vector<1x8x32xf32>,
    %c4 = arith.constant 4 : index
    %c0_68 = arith.constant 0 : index
    %c0_69 = arith.constant 0 : index
    %c0_70 = arith.constant 0 : index
    %181 = vector.load %arg1[%c4, %c0_68, %c0_69, %c0_70] : memref<8x4x8x32xf32, #tpu.memory_space<vmem>>, vector<1x4x8x32xf32>
    %182 = vector.shape_cast %181 : vector<1x4x8x32xf32> to vector<4x8x32xf32>
    %183 = vector.extract_strided_slice %182 {offsets = [0, 0, 0], sizes = [1, 8, 32], strides = [1, 1, 1]} : vector<4x8x32xf32> to vector<1x8x32xf32>
    %184 = vector.shape_cast %183 : vector<1x8x32xf32> to vector<8x32xf32>
    %cst_71 = arith.constant dense<0.000000e+00> : vector<8x32xf32>
    %185 = tpu.matmul %177, %4, %cst_71 {dimension_numbers = #tpu.dot_dimension_numbers<[1], [0], [0], [1], [0, 0, 1, 1], [], []>} : vector<8x32xf32>, vector<32x32xf32>, vector<8x32xf32> -> vector<8x32xf32>
    %186 = arith.addf %184, %185 : vector<8x32xf32>
    %187 = vector.extract_strided_slice %182 {offsets = [1, 0, 0], sizes = [1, 8, 32], strides = [1, 1, 1]} : vector<4x8x32xf32> to vector<1x8x32xf32>
    %188 = vector.shape_cast %187 : vector<1x8x32xf32> to vector<8x32xf32>
    %cst_72 = arith.constant dense<0.000000e+00> : vector<8x32xf32>
    %189 = tpu.matmul %177, %6, %cst_72 {dimension_numbers = #tpu.dot_dimension_numbers<[1], [0], [0], [1], [0, 0, 1, 1], [], []>} : vector<8x32xf32>, vector<32x32xf32>, vector<8x32xf32> -> vector<8x32xf32>
    %190 = arith.addf %188, %189 : vector<8x32xf32>
    %191 = vector.extract_strided_slice %182 {offsets = [2, 0, 0], sizes = [1, 8, 32], strides = [1, 1, 1]} : vector<4x8x32xf32> to vector<1x8x32xf32>
    %192 = vector.shape_cast %191 : vector<1x8x32xf32> to vector<8x32xf32>
    %cst_73 = arith.constant dense<0.000000e+00> : vector<8x32xf32>
    %193 = tpu.matmul %177, %8, %cst_73 {dimension_numbers = #tpu.dot_dimension_numbers<[1], [0], [0], [1], [0, 0, 1, 1], [], []>} : vector<8x32xf32>, vector<32x32xf32>, vector<8x32xf32> -> vector<8x32xf32>
    %194 = arith.addf %192, %193 : vector<8x32xf32>
    %195 = vector.extract_strided_slice %182 {offsets = [3, 0, 0], sizes = [1, 8, 32], strides = [1, 1, 1]} : vector<4x8x32xf32> to vector<1x8x32xf32>
    %196 = vector.shape_cast %195 : vector<1x8x32xf32> to vector<8x32xf32>
    %cst_74 = arith.constant dense<0.000000e+00> : vector<8x32xf32>
    %197 = tpu.matmul %177, %10, %cst_74 {dimension_numbers = #tpu.dot_dimension_numbers<[1], [0], [0], [1], [0, 0, 1, 1], [], []>} : vector<8x32xf32>, vector<32x32xf32>, vector<8x32xf32> -> vector<8x32xf32>
    %198 = arith.addf %196, %197 : vector<8x32xf32>
    %199 = arith.negf %186 : vector<8x32xf32>
    %200 = math.exp %199 : vector<8x32xf32>
    %cst_75 = arith.constant 1.000000e+00 : f32
    %201 = vector.broadcast %cst_75 : f32 to vector<8x32xf32>
    %202 = arith.addf %201, %200 : vector<8x32xf32>
    %203 = arith.divf %201, %202 : vector<8x32xf32>
    %204 = arith.negf %190 : vector<8x32xf32>
    %205 = math.exp %204 : vector<8x32xf32>
    %cst_76 = arith.constant 1.000000e+00 : f32
    %206 = vector.broadcast %cst_76 : f32 to vector<8x32xf32>
    %207 = arith.addf %206, %205 : vector<8x32xf32>
    %208 = arith.divf %206, %207 : vector<8x32xf32>
    %209 = math.tanh %194 : vector<8x32xf32>
    %210 = arith.negf %198 : vector<8x32xf32>
    %211 = math.exp %210 : vector<8x32xf32>
    %cst_77 = arith.constant 1.000000e+00 : f32
    %212 = vector.broadcast %cst_77 : f32 to vector<8x32xf32>
    %213 = arith.addf %212, %211 : vector<8x32xf32>
    %214 = arith.divf %212, %213 : vector<8x32xf32>
    %215 = arith.mulf %208, %175 : vector<8x32xf32>
    %216 = arith.mulf %203, %209 : vector<8x32xf32>
    %217 = arith.addf %215, %216 : vector<8x32xf32>
    %218 = math.tanh %217 : vector<8x32xf32>
    %219 = arith.mulf %214, %218 : vector<8x32xf32>
    %c4_78 = arith.constant 4 : index
    %c0_79 = arith.constant 0 : index
    %c0_80 = arith.constant 0 : index
    %220 = vector.load %arg5[%c4_78, %c0_79, %c0_80] : memref<8x8x32xf32, #tpu.memory_space<vmem>>, vector<1x8x32xf32>
    %221 = vector.shape_cast %220 : vector<1x8x32xf32> to vector<8x32xf32>
    %222 = vector.shape_cast %219 : vector<8x32xf32> to vector<1x8x32xf32>
    tpu.vector_store %arg5[%c4_78, %c0_79, %c0_80], %222 {strides = array<i32>} : memref<8x8x32xf32, #tpu.memory_space<vmem>>, vector<1x8x32xf32>,
    %c5 = arith.constant 5 : index
    %c0_81 = arith.constant 0 : index
    %c0_82 = arith.constant 0 : index
    %c0_83 = arith.constant 0 : index
    %223 = vector.load %arg1[%c5, %c0_81, %c0_82, %c0_83] : memref<8x4x8x32xf32, #tpu.memory_space<vmem>>, vector<1x4x8x32xf32>
    %224 = vector.shape_cast %223 : vector<1x4x8x32xf32> to vector<4x8x32xf32>
    %225 = vector.extract_strided_slice %224 {offsets = [0, 0, 0], sizes = [1, 8, 32], strides = [1, 1, 1]} : vector<4x8x32xf32> to vector<1x8x32xf32>
    %226 = vector.shape_cast %225 : vector<1x8x32xf32> to vector<8x32xf32>
    %cst_84 = arith.constant dense<0.000000e+00> : vector<8x32xf32>
    %227 = tpu.matmul %219, %4, %cst_84 {dimension_numbers = #tpu.dot_dimension_numbers<[1], [0], [0], [1], [0, 0, 1, 1], [], []>} : vector<8x32xf32>, vector<32x32xf32>, vector<8x32xf32> -> vector<8x32xf32>
    %228 = arith.addf %226, %227 : vector<8x32xf32>
    %229 = vector.extract_strided_slice %224 {offsets = [1, 0, 0], sizes = [1, 8, 32], strides = [1, 1, 1]} : vector<4x8x32xf32> to vector<1x8x32xf32>
    %230 = vector.shape_cast %229 : vector<1x8x32xf32> to vector<8x32xf32>
    %cst_85 = arith.constant dense<0.000000e+00> : vector<8x32xf32>
    %231 = tpu.matmul %219, %6, %cst_85 {dimension_numbers = #tpu.dot_dimension_numbers<[1], [0], [0], [1], [0, 0, 1, 1], [], []>} : vector<8x32xf32>, vector<32x32xf32>, vector<8x32xf32> -> vector<8x32xf32>
    %232 = arith.addf %230, %231 : vector<8x32xf32>
    %233 = vector.extract_strided_slice %224 {offsets = [2, 0, 0], sizes = [1, 8, 32], strides = [1, 1, 1]} : vector<4x8x32xf32> to vector<1x8x32xf32>
    %234 = vector.shape_cast %233 : vector<1x8x32xf32> to vector<8x32xf32>
    %cst_86 = arith.constant dense<0.000000e+00> : vector<8x32xf32>
    %235 = tpu.matmul %219, %8, %cst_86 {dimension_numbers = #tpu.dot_dimension_numbers<[1], [0], [0], [1], [0, 0, 1, 1], [], []>} : vector<8x32xf32>, vector<32x32xf32>, vector<8x32xf32> -> vector<8x32xf32>
    %236 = arith.addf %234, %235 : vector<8x32xf32>
    %237 = vector.extract_strided_slice %224 {offsets = [3, 0, 0], sizes = [1, 8, 32], strides = [1, 1, 1]} : vector<4x8x32xf32> to vector<1x8x32xf32>
    %238 = vector.shape_cast %237 : vector<1x8x32xf32> to vector<8x32xf32>
    %cst_87 = arith.constant dense<0.000000e+00> : vector<8x32xf32>
    %239 = tpu.matmul %219, %10, %cst_87 {dimension_numbers = #tpu.dot_dimension_numbers<[1], [0], [0], [1], [0, 0, 1, 1], [], []>} : vector<8x32xf32>, vector<32x32xf32>, vector<8x32xf32> -> vector<8x32xf32>
    %240 = arith.addf %238, %239 : vector<8x32xf32>
    %241 = arith.negf %228 : vector<8x32xf32>
    %242 = math.exp %241 : vector<8x32xf32>
    %cst_88 = arith.constant 1.000000e+00 : f32
    %243 = vector.broadcast %cst_88 : f32 to vector<8x32xf32>
    %244 = arith.addf %243, %242 : vector<8x32xf32>
    %245 = arith.divf %243, %244 : vector<8x32xf32>
    %246 = arith.negf %232 : vector<8x32xf32>
    %247 = math.exp %246 : vector<8x32xf32>
    %cst_89 = arith.constant 1.000000e+00 : f32
    %248 = vector.broadcast %cst_89 : f32 to vector<8x32xf32>
    %249 = arith.addf %248, %247 : vector<8x32xf32>
    %250 = arith.divf %248, %249 : vector<8x32xf32>
    %251 = math.tanh %236 : vector<8x32xf32>
    %252 = arith.negf %240 : vector<8x32xf32>
    %253 = math.exp %252 : vector<8x32xf32>
    %cst_90 = arith.constant 1.000000e+00 : f32
    %254 = vector.broadcast %cst_90 : f32 to vector<8x32xf32>
    %255 = arith.addf %254, %253 : vector<8x32xf32>
    %256 = arith.divf %254, %255 : vector<8x32xf32>
    %257 = arith.mulf %250, %217 : vector<8x32xf32>
    %258 = arith.mulf %245, %251 : vector<8x32xf32>
    %259 = arith.addf %257, %258 : vector<8x32xf32>
    %260 = math.tanh %259 : vector<8x32xf32>
    %261 = arith.mulf %256, %260 : vector<8x32xf32>
    %c5_91 = arith.constant 5 : index
    %c0_92 = arith.constant 0 : index
    %c0_93 = arith.constant 0 : index
    %262 = vector.load %arg5[%c5_91, %c0_92, %c0_93] : memref<8x8x32xf32, #tpu.memory_space<vmem>>, vector<1x8x32xf32>
    %263 = vector.shape_cast %262 : vector<1x8x32xf32> to vector<8x32xf32>
    %264 = vector.shape_cast %261 : vector<8x32xf32> to vector<1x8x32xf32>
    tpu.vector_store %arg5[%c5_91, %c0_92, %c0_93], %264 {strides = array<i32>} : memref<8x8x32xf32, #tpu.memory_space<vmem>>, vector<1x8x32xf32>,
    %c6 = arith.constant 6 : index
    %c0_94 = arith.constant 0 : index
    %c0_95 = arith.constant 0 : index
    %c0_96 = arith.constant 0 : index
    %265 = vector.load %arg1[%c6, %c0_94, %c0_95, %c0_96] : memref<8x4x8x32xf32, #tpu.memory_space<vmem>>, vector<1x4x8x32xf32>
    %266 = vector.shape_cast %265 : vector<1x4x8x32xf32> to vector<4x8x32xf32>
    %267 = vector.extract_strided_slice %266 {offsets = [0, 0, 0], sizes = [1, 8, 32], strides = [1, 1, 1]} : vector<4x8x32xf32> to vector<1x8x32xf32>
    %268 = vector.shape_cast %267 : vector<1x8x32xf32> to vector<8x32xf32>
    %cst_97 = arith.constant dense<0.000000e+00> : vector<8x32xf32>
    %269 = tpu.matmul %261, %4, %cst_97 {dimension_numbers = #tpu.dot_dimension_numbers<[1], [0], [0], [1], [0, 0, 1, 1], [], []>} : vector<8x32xf32>, vector<32x32xf32>, vector<8x32xf32> -> vector<8x32xf32>
    %270 = arith.addf %268, %269 : vector<8x32xf32>
    %271 = vector.extract_strided_slice %266 {offsets = [1, 0, 0], sizes = [1, 8, 32], strides = [1, 1, 1]} : vector<4x8x32xf32> to vector<1x8x32xf32>
    %272 = vector.shape_cast %271 : vector<1x8x32xf32> to vector<8x32xf32>
    %cst_98 = arith.constant dense<0.000000e+00> : vector<8x32xf32>
    %273 = tpu.matmul %261, %6, %cst_98 {dimension_numbers = #tpu.dot_dimension_numbers<[1], [0], [0], [1], [0, 0, 1, 1], [], []>} : vector<8x32xf32>, vector<32x32xf32>, vector<8x32xf32> -> vector<8x32xf32>
    %274 = arith.addf %272, %273 : vector<8x32xf32>
    %275 = vector.extract_strided_slice %266 {offsets = [2, 0, 0], sizes = [1, 8, 32], strides = [1, 1, 1]} : vector<4x8x32xf32> to vector<1x8x32xf32>
    %276 = vector.shape_cast %275 : vector<1x8x32xf32> to vector<8x32xf32>
    %cst_99 = arith.constant dense<0.000000e+00> : vector<8x32xf32>
    %277 = tpu.matmul %261, %8, %cst_99 {dimension_numbers = #tpu.dot_dimension_numbers<[1], [0], [0], [1], [0, 0, 1, 1], [], []>} : vector<8x32xf32>, vector<32x32xf32>, vector<8x32xf32> -> vector<8x32xf32>
    %278 = arith.addf %276, %277 : vector<8x32xf32>
    %279 = vector.extract_strided_slice %266 {offsets = [3, 0, 0], sizes = [1, 8, 32], strides = [1, 1, 1]} : vector<4x8x32xf32> to vector<1x8x32xf32>
    %280 = vector.shape_cast %279 : vector<1x8x32xf32> to vector<8x32xf32>
    %cst_100 = arith.constant dense<0.000000e+00> : vector<8x32xf32>
    %281 = tpu.matmul %261, %10, %cst_100 {dimension_numbers = #tpu.dot_dimension_numbers<[1], [0], [0], [1], [0, 0, 1, 1], [], []>} : vector<8x32xf32>, vector<32x32xf32>, vector<8x32xf32> -> vector<8x32xf32>
    %282 = arith.addf %280, %281 : vector<8x32xf32>
    %283 = arith.negf %270 : vector<8x32xf32>
    %284 = math.exp %283 : vector<8x32xf32>
    %cst_101 = arith.constant 1.000000e+00 : f32
    %285 = vector.broadcast %cst_101 : f32 to vector<8x32xf32>
    %286 = arith.addf %285, %284 : vector<8x32xf32>
    %287 = arith.divf %285, %286 : vector<8x32xf32>
    %288 = arith.negf %274 : vector<8x32xf32>
    %289 = math.exp %288 : vector<8x32xf32>
    %cst_102 = arith.constant 1.000000e+00 : f32
    %290 = vector.broadcast %cst_102 : f32 to vector<8x32xf32>
    %291 = arith.addf %290, %289 : vector<8x32xf32>
    %292 = arith.divf %290, %291 : vector<8x32xf32>
    %293 = math.tanh %278 : vector<8x32xf32>
    %294 = arith.negf %282 : vector<8x32xf32>
    %295 = math.exp %294 : vector<8x32xf32>
    %cst_103 = arith.constant 1.000000e+00 : f32
    %296 = vector.broadcast %cst_103 : f32 to vector<8x32xf32>
    %297 = arith.addf %296, %295 : vector<8x32xf32>
    %298 = arith.divf %296, %297 : vector<8x32xf32>
    %299 = arith.mulf %292, %259 : vector<8x32xf32>
    %300 = arith.mulf %287, %293 : vector<8x32xf32>
    %301 = arith.addf %299, %300 : vector<8x32xf32>
    %302 = math.tanh %301 : vector<8x32xf32>
    %303 = arith.mulf %298, %302 : vector<8x32xf32>
    %c6_104 = arith.constant 6 : index
    %c0_105 = arith.constant 0 : index
    %c0_106 = arith.constant 0 : index
    %304 = vector.load %arg5[%c6_104, %c0_105, %c0_106] : memref<8x8x32xf32, #tpu.memory_space<vmem>>, vector<1x8x32xf32>
    %305 = vector.shape_cast %304 : vector<1x8x32xf32> to vector<8x32xf32>
    %306 = vector.shape_cast %303 : vector<8x32xf32> to vector<1x8x32xf32>
    tpu.vector_store %arg5[%c6_104, %c0_105, %c0_106], %306 {strides = array<i32>} : memref<8x8x32xf32, #tpu.memory_space<vmem>>, vector<1x8x32xf32>,
    %c7 = arith.constant 7 : index
    %c0_107 = arith.constant 0 : index
    %c0_108 = arith.constant 0 : index
    %c0_109 = arith.constant 0 : index
    %307 = vector.load %arg1[%c7, %c0_107, %c0_108, %c0_109] : memref<8x4x8x32xf32, #tpu.memory_space<vmem>>, vector<1x4x8x32xf32>
    %308 = vector.shape_cast %307 : vector<1x4x8x32xf32> to vector<4x8x32xf32>
    %309 = vector.extract_strided_slice %308 {offsets = [0, 0, 0], sizes = [1, 8, 32], strides = [1, 1, 1]} : vector<4x8x32xf32> to vector<1x8x32xf32>
    %310 = vector.shape_cast %309 : vector<1x8x32xf32> to vector<8x32xf32>
    %cst_110 = arith.constant dense<0.000000e+00> : vector<8x32xf32>
    %311 = tpu.matmul %303, %4, %cst_110 {dimension_numbers = #tpu.dot_dimension_numbers<[1], [0], [0], [1], [0, 0, 1, 1], [], []>} : vector<8x32xf32>, vector<32x32xf32>, vector<8x32xf32> -> vector<8x32xf32>
    %312 = arith.addf %310, %311 : vector<8x32xf32>
    %313 = vector.extract_strided_slice %308 {offsets = [1, 0, 0], sizes = [1, 8, 32], strides = [1, 1, 1]} : vector<4x8x32xf32> to vector<1x8x32xf32>
    %314 = vector.shape_cast %313 : vector<1x8x32xf32> to vector<8x32xf32>
    %cst_111 = arith.constant dense<0.000000e+00> : vector<8x32xf32>
    %315 = tpu.matmul %303, %6, %cst_111 {dimension_numbers = #tpu.dot_dimension_numbers<[1], [0], [0], [1], [0, 0, 1, 1], [], []>} : vector<8x32xf32>, vector<32x32xf32>, vector<8x32xf32> -> vector<8x32xf32>
    %316 = arith.addf %314, %315 : vector<8x32xf32>
    %317 = vector.extract_strided_slice %308 {offsets = [2, 0, 0], sizes = [1, 8, 32], strides = [1, 1, 1]} : vector<4x8x32xf32> to vector<1x8x32xf32>
    %318 = vector.shape_cast %317 : vector<1x8x32xf32> to vector<8x32xf32>
    %cst_112 = arith.constant dense<0.000000e+00> : vector<8x32xf32>
    %319 = tpu.matmul %303, %8, %cst_112 {dimension_numbers = #tpu.dot_dimension_numbers<[1], [0], [0], [1], [0, 0, 1, 1], [], []>} : vector<8x32xf32>, vector<32x32xf32>, vector<8x32xf32> -> vector<8x32xf32>
    %320 = arith.addf %318, %319 : vector<8x32xf32>
    %321 = vector.extract_strided_slice %308 {offsets = [3, 0, 0], sizes = [1, 8, 32], strides = [1, 1, 1]} : vector<4x8x32xf32> to vector<1x8x32xf32>
    %322 = vector.shape_cast %321 : vector<1x8x32xf32> to vector<8x32xf32>
    %cst_113 = arith.constant dense<0.000000e+00> : vector<8x32xf32>
    %323 = tpu.matmul %303, %10, %cst_113 {dimension_numbers = #tpu.dot_dimension_numbers<[1], [0], [0], [1], [0, 0, 1, 1], [], []>} : vector<8x32xf32>, vector<32x32xf32>, vector<8x32xf32> -> vector<8x32xf32>
    %324 = arith.addf %322, %323 : vector<8x32xf32>
    %325 = arith.negf %312 : vector<8x32xf32>
    %326 = math.exp %325 : vector<8x32xf32>
    %cst_114 = arith.constant 1.000000e+00 : f32
    %327 = vector.broadcast %cst_114 : f32 to vector<8x32xf32>
    %328 = arith.addf %327, %326 : vector<8x32xf32>
    %329 = arith.divf %327, %328 : vector<8x32xf32>
    %330 = arith.negf %316 : vector<8x32xf32>
    %331 = math.exp %330 : vector<8x32xf32>
    %cst_115 = arith.constant 1.000000e+00 : f32
    %332 = vector.broadcast %cst_115 : f32 to vector<8x32xf32>
    %333 = arith.addf %332, %331 : vector<8x32xf32>
    %334 = arith.divf %332, %333 : vector<8x32xf32>
    %335 = math.tanh %320 : vector<8x32xf32>
    %336 = arith.negf %324 : vector<8x32xf32>
    %337 = math.exp %336 : vector<8x32xf32>
    %cst_116 = arith.constant 1.000000e+00 : f32
    %338 = vector.broadcast %cst_116 : f32 to vector<8x32xf32>
    %339 = arith.addf %338, %337 : vector<8x32xf32>
    %340 = arith.divf %338, %339 : vector<8x32xf32>
    %341 = arith.mulf %334, %301 : vector<8x32xf32>
    %342 = arith.mulf %329, %335 : vector<8x32xf32>
    %343 = arith.addf %341, %342 : vector<8x32xf32>
    %344 = math.tanh %343 : vector<8x32xf32>
    %345 = arith.mulf %340, %344 : vector<8x32xf32>
    %c7_117 = arith.constant 7 : index
    %c0_118 = arith.constant 0 : index
    %c0_119 = arith.constant 0 : index
    %346 = vector.load %arg5[%c7_117, %c0_118, %c0_119] : memref<8x8x32xf32, #tpu.memory_space<vmem>>, vector<1x8x32xf32>
    %347 = vector.shape_cast %346 : vector<1x8x32xf32> to vector<8x32xf32>
    %348 = vector.shape_cast %345 : vector<8x32xf32> to vector<1x8x32xf32>
    tpu.vector_store %arg5[%c7_117, %c0_118, %c0_119], %348 {strides = array<i32>} : memref<8x8x32xf32, #tpu.memory_space<vmem>>, vector<1x8x32xf32>,
    %c0_120 = arith.constant 0 : index
    %c0_121 = arith.constant 0 : index
    %349 = vector.load %arg8[%c0_120, %c0_121] : memref<8x32xf32, #tpu.memory_space<vmem>>, vector<8x32xf32>
    tpu.vector_store %arg8[%c0_120, %c0_121], %345 {strides = array<i32>} : memref<8x32xf32, #tpu.memory_space<vmem>>, vector<8x32xf32>,
    %c0_122 = arith.constant 0 : index
    %c0_123 = arith.constant 0 : index
    %350 = vector.load %arg9[%c0_122, %c0_123] : memref<8x32xf32, #tpu.memory_space<vmem>>, vector<8x32xf32>
    tpu.vector_store %arg9[%c0_122, %c0_123], %343 {strides = array<i32>} : memref<8x32xf32, #tpu.memory_space<vmem>>, vector<8x32xf32>,
    %c0_i32_124 = arith.constant 0 : i32
    %351 = arith.cmpi eq, %arg0, %c0_i32_124 : i32
    %352 = arith.extui %351 : i1 to i32
    %c0_i32_125 = arith.constant 0 : i32
    %353 = arith.cmpi ne, %352, %c0_i32_125 : i32
    scf.if %353 {
      %c0_126 = arith.constant 0 : index
      %c0_127 = arith.constant 0 : index
      %354 = vector.load %arg6[%c0_126, %c0_127] : memref<8x32xf32, #tpu.memory_space<vmem>>, vector<8x32xf32>
      tpu.vector_store %arg6[%c0_126, %c0_127], %345 {strides = array<i32>} : memref<8x32xf32, #tpu.memory_space<vmem>>, vector<8x32xf32>,
      %c0_128 = arith.constant 0 : index
      %c0_129 = arith.constant 0 : index
      %355 = vector.load %arg7[%c0_128, %c0_129] : memref<8x32xf32, #tpu.memory_space<vmem>>, vector<8x32xf32>
      tpu.vector_store %arg7[%c0_128, %c0_129], %343 {strides = array<i32>} : memref<8x32xf32, #tpu.memory_space<vmem>>, vector<8x32xf32>,
    } else {
    }
    return
  }
  func.func @transform_0(%arg0: i32) -> (i32, i32, i32, i32) {
    %c0_i32 = arith.constant 0 : i32
    %c0_i32_0 = arith.constant 0 : i32
    %c0_i32_1 = arith.constant 0 : i32
    %c0_i32_2 = arith.constant 0 : i32
    return %arg0, %c0_i32, %c0_i32_0, %c0_i32_1 : i32, i32, i32, i32
  }
  func.func @transform_1(%arg0: i32) -> (i32, i32, i32) {
    %c0_i32 = arith.constant 0 : i32
    %c0_i32_0 = arith.constant 0 : i32
    %c0_i32_1 = arith.constant 0 : i32
    %c0_i32_2 = arith.constant 0 : i32
    return %c0_i32, %c0_i32_0, %c0_i32_1 : i32, i32, i32
  }
  func.func @transform_2(%arg0: i32) -> (i32, i32) {
    %c0_i32 = arith.constant 0 : i32
    %c0_i32_0 = arith.constant 0 : i32
    %c0_i32_1 = arith.constant 0 : i32
    return %c0_i32, %c0_i32_0 : i32, i32
  }
  func.func @transform_3(%arg0: i32) -> (i32, i32) {
    %c0_i32 = arith.constant 0 : i32
    %c0_i32_0 = arith.constant 0 : i32
    %c0_i32_1 = arith.constant 0 : i32
    return %c0_i32, %c0_i32_0 : i32, i32
  }
  func.func @transform_4(%arg0: i32) -> (i32, i32, i32) {
    %c0_i32 = arith.constant 0 : i32
    %c0_i32_0 = arith.constant 0 : i32
    %c0_i32_1 = arith.constant 0 : i32
    return %arg0, %c0_i32, %c0_i32_0 : i32, i32, i32
  }
  func.func @transform_5(%arg0: i32) -> (i32, i32) {
    %c0_i32 = arith.constant 0 : i32
    %c0_i32_0 = arith.constant 0 : i32
    %c0_i32_1 = arith.constant 0 : i32
    return %c0_i32, %c0_i32_0 : i32, i32
  }
  func.func @transform_6(%arg0: i32) -> (i32, i32) {
    %c0_i32 = arith.constant 0 : i32
    %c0_i32_0 = arith.constant 0 : i32
    %c0_i32_1 = arith.constant 0 : i32
    return %c0_i32, %c0_i32_0 : i32, i32
  }
}

</mosaic_0001>

<bundles_post_ra>
// kernel: tpu_custom_call.1
= control target key start
LH: loop header
LB: loop body
LE: loop exit
PB: predicated region body
PF: predicated region fallthrough
CT: control target
= control target key end

     0   :  { %12 = vsyncpa [#allocation5], 0  ;;  %s4064_s0 = inlined_call_operand.hbm [shape: f32[8,4,8,32], index: 0, kind: input, shape index: {}]   ;;  %s4065_s1 = inlined_call_operand.hbm [shape: f32[4,32,32], index: 1, kind: input, shape index: {}]   ;;  %s4066_s2 = inlined_call_operand.hbm [shape: f32[8,32], index: 2, kind: input, shape index: {}]   ;;  %s4067_s3 = inlined_call_operand.hbm [shape: f32[8,32], index: 3, kind: input, shape index: {}]   ;;  %s4068_s4 = inlined_call_operand.hbm [shape: f32[8,8,32], index: 4, kind: output, shape index: {0}]   ;;  %s4069_s5 = inlined_call_operand.hbm [shape: f32[8,32], index: 5, kind: output, shape index: {1}]   ;;  %s4070_s6 = inlined_call_operand.hbm [shape: f32[8,32], index: 6, kind: output, shape index: {2}]  }
   0x1   :  { %13 = vsyncpa [#allocation8], 0 }
   0x2   :  { %14 = vsyncpa [#allocation11], 0 }
   0x3   :  { %15 = vsyncpa [#allocation6], 0 }
   0x4   :  { %16 = vsyncpa [#allocation14], 0  ;;  %s3572_s21 = smov [#allocation7]   ;;  %s3573_s23 = smov [#allocation4]  }
   0x5   :  { %s34_s22 = sshll.u32 %s3572_s21, 4  ;;  %s22_s24 = sshll.u32 %s3573_s23, 4  ;;  %s35_s22 = int_to_ptr.vmem [resolvable:$true] %s34_s22  ;;  %s23_s24 = int_to_ptr.vmem [resolvable:$true] %s22_s24 }
   0x6   :  { %s3430_s25 = scalar_lea.vmem %s35_s22, 2048  ;;  %p3435_p1 = scmp.lt.s32.totalorder %s35_s22, %s35_s22 }
   0x7   :  { %p3431_p0 = scmp.ne.s32.totalorder %s35_s22, %s3430_s25  ;;  %p3436_p2 = scmp.lt.s32.totalorder %s3430_s25, %s3430_s25 }
   0x9   :  { %p3437_p3 = por %p3436_p2, %p3435_p1 }
   0xb   :  { %p3438_p4 = pnand %p3437_p3, %p3431_p0 }
   0xd   :  { %3441 = shalt.err (!%p3438_p4)
}
   0xe   :  { %s3574_s26 = smov 128   ;;  %s3575_s27 = smov 8  }
   0xf   :  { %40 = dma.hbm_to_vmem [thread:$0]  %s4065_s1, 2048, %s35_s22, [#allocation8], %s3574_s26, %s3574_s26, %s3575_s27  }
  0x10   :  { %s3450_s30 = scalar_lea.vmem %s23_s24, 4096  ;;  %p3455_p6 = scmp.lt.s32.totalorder %s23_s24, %s23_s24 }
  0x11   :  { %p3451_p5 = scmp.ne.s32.totalorder %s23_s24, %s3450_s30  ;;  %p3456_p7 = scmp.lt.s32.totalorder %s3450_s30, %s3450_s30 }
  0x13   :  { %p3457_p8 = por %p3456_p7, %p3455_p6 }
  0x15   :  { %p3458_p9 = pnand %p3457_p8, %p3451_p5 }
  0x17   :  { %3461 = shalt.err (!%p3458_p9)
}
  0x18   :  { %28 = dma.hbm_to_vmem [thread:$0]  %s4064_s0, 4096, %s23_s24, [#allocation5], %s3574_s26, %s3574_s26, %s3575_s27  }
  0x19   :  { %s3576_s9 = smov [#allocation9]   ;;  %s3577_s11 = smov [#allocation10]  }
  0x1a   :  { %s47_s10 = sshll.u32 %s3576_s9, 4  ;;  %s57_s12 = sshll.u32 %s3577_s11, 4  ;;  %s48_s10 = int_to_ptr.vmem [resolvable:$true] %s47_s10  ;;  %s58_s12 = int_to_ptr.vmem [resolvable:$true] %s57_s12 }
  0x1b   :  { %s3470_s1 = scalar_lea.vmem %s48_s10, 128  ;;  %p3475_p11 = scmp.lt.s32.totalorder %s48_s10, %s48_s10 }
  0x1c   :  { %p3471_p10 = scmp.ne.s32.totalorder %s48_s10, %s3470_s1  ;;  %p3476_p12 = scmp.lt.s32.totalorder %s3470_s1, %s3470_s1 }
  0x1e   :  { %p3477_p13 = por %p3476_p12, %p3475_p11 }
  0x20   :  { %p3478_p0 = pnand %p3477_p13, %p3471_p10 }
  0x22   :  { %3481 = shalt.err (!%p3478_p0)
}
  0x23   :  { %50 = dma.hbm_to_vmem [thread:$0]  %s4066_s2, 128, %s48_s10, [#allocation8]  }
  0x24   :  { %s3490_s15 = scalar_lea.vmem %s58_s12, 128  ;;  %p3495_p2 = scmp.lt.s32.totalorder %s58_s12, %s58_s12 }
  0x25   :  { %p3491_p1 = scmp.ne.s32.totalorder %s58_s12, %s3490_s15  ;;  %p3496_p3 = scmp.lt.s32.totalorder %s3490_s15, %s3490_s15 }
  0x27   :  { %p3497_p4 = por %p3496_p3, %p3495_p2 }
  0x29   :  { %p3498_p5 = pnand %p3497_p4, %p3491_p1 }
  0x2b   :  { %3501 = shalt.err (!%p3498_p5)
}
  0x2c   :  { %60 = dma.hbm_to_vmem [thread:$0]  %s4067_s3, 128, %s58_s12, [#allocation11]  }
  0x2d   :  { %3562 = dma.done.wait [#allocation5], 4096  }
  0x2e   :  { %3563 = vsyncadd [#allocation5], 4294963200 }
  0x2f   :  { %3564 = dma.done.wait [#allocation8], 2176  }
  0x30   :  { %3565 = vsyncadd [#allocation8], 4294965120 }
  0x31   :  { %3566 = dma.done.wait [#allocation11], 128  }
  0x32   :  { %3567 = vsyncadd [#allocation11], 4294967168  ;;  %v3578_v0 = vmov 0.0   ;;  %vm3579_vm0 = vmmov 0   ;;  %v3642_v1 = vld [vmem:[#allocation7 + $0x18] sm:$0xff]  ;;  %v3646_v3 = vld [vmem:[#allocation7 + $0x10] sm:$0xff] }
  0x33   :  { %2915 = vmatprep.subr.mxu0 %v3578_v0  ;;  %2926 = vmatprep.subr.mxu1 %v3578_v0  ;;  %v3644_v2 = vld [vmem:[#allocation7 + $0x38] sm:$0xff]  ;;  %vm78_vm1 = vcmask 261120   ;;  %v3650_v4 = vld [vmem:[#allocation7 + $0x30] sm:$0xff]  ;;  %v3654_v5 = vld [vmem:[#allocation7 + $0x8] sm:$0xff]  ;;  %s3580_s2 = smov [#allocation13]   ;;  %s3581_s17 = smov [#allocation12]  }
  0x34   :  { %2923 = vmatprep.mubr.msk.f32.mxu0 %vm3579_vm0, %v3578_v0  ;;  %2934 = vmatprep.mubr.msk.f32.mxu1 %vm3579_vm0, %v3578_v0  ;;  %v3656_v6 = vld [vmem:[#allocation7 + $0x28] sm:$0xff]  ;;  %v77_v7 = vld [vmem:[#allocation9] sm:$0xff]  ;;  %v3675_v10 = vld [vmem:[#allocation7 + $0x58] sm:$0xff]  ;;  %s2671_s3 = sshll.u32 %s3580_s2, 4  ;;  %s2658_s18 = sshll.u32 %s3581_s17, 4  ;;  %s2672_s3 = int_to_ptr.vmem [resolvable:$true] %s2671_s3  ;;  %s2659_s18 = int_to_ptr.vmem [resolvable:$true] %s2658_s18 }
  0x35   :  { %2916 = vmatpush3.msra.mxu0 %v3642_v1  ;;  %2927 = vmatpush3.msra.mxu1 %v3644_v2  ;;  %79 = vst.msk [vmem:[#allocation2] sm:$0xff] %vm78_vm1, %v77_v7  ;;  %v3663_v8 = vld [vmem:[#allocation7] sm:$0xff]  ;;  %v3677_v11 = vld [vmem:[#allocation7 + $0x78] sm:$0xff]  ;;  %v3681_v13 = vld [vmem:[#allocation7 + $0x50] sm:$0xff]  ;;  %s3582_s19 = smov [#allocation15]   ;;  %s3502_s21 = scalar_lea.vmem %s2672_s3, 128 }
  0x36   :  { %2917 = vmatprep.subr.mxu0 %v3578_v0  ;;  %2928 = vmatprep.subr.mxu1 %v3578_v0  ;;  %v3665_v9 = vld [vmem:[#allocation7 + $0x20] sm:$0xff]  ;;  %v3683_v14 = vld [vmem:[#allocation7 + $0x70] sm:$0xff]  ;;  %v3689_v15 = vld [vmem:[#allocation7 + $0x48] sm:$0xff]  ;;  %s2681_s20 = sshll.u32 %s3582_s19, 4  ;;  %p3503_p6 = scmp.ne.s32.totalorder %s2672_s3, %s3502_s21  ;;  %s2682_s20 = int_to_ptr.vmem [resolvable:$true] %s2681_s20 }
  0x37   :  { %2918 = vmatpush3.msra.mxu0 %v3646_v3  ;;  %2929 = vmatpush3.msra.mxu1 %v3650_v4  ;;  %v3691_v16 = vld [vmem:[#allocation7 + $0x68] sm:$0xff]  ;;  %v3697_v17 = vld [vmem:[#allocation7 + $0x40] sm:$0xff]  ;;  %v106_v30 = vld [vmem:[#allocation4 + $0x18] sm:$0xff]  ;;  %p3507_p7 = scmp.lt.s32.totalorder %s2672_s3, %s2672_s3  ;;  %p3508_p8 = scmp.lt.s32.totalorder %s3502_s21, %s3502_s21 }
  0x38   :  { %2919 = vmatprep.subr.mxu0 %v3578_v0  ;;  %2930 = vmatprep.subr.mxu1 %v3578_v0  ;;  %v3701_v18 = vld [vmem:[#allocation7 + $0x60] sm:$0xff]  ;;  %v80_v19 = vld [vmem:[#allocation10] sm:$0xff]  ;;  %v105_v36 = vld [vmem:[#allocation4 + $0x10] sm:$0xff] }
  0x39   :  { %2920 = vmatpush3.msra.mxu0 %v3654_v5  ;;  %2931 = vmatpush3.msra.mxu1 %v3656_v6  ;;  %81 = vst.msk [vmem:[#allocation3] sm:$0xff] %vm78_vm1, %v80_v19  ;;  %v103_v20 = vld [vmem:[#allocation4] sm:$0xff]  ;;  %v104_v21 = vld [vmem:[#allocation4 + $0x8] sm:$0xff]  ;;  %p3509_p9 = por %p3508_p8, %p3507_p7 }
  0x3a   :  { %2921 = vmatprep.subr.mxu0 %v3578_v0  ;;  %2932 = vmatprep.subr.mxu1 %v3578_v0  ;;  %v421_v55 = vld [vmem:[#allocation4 + $0x20] sm:$0xff]  ;;  %v422_v56 = vld [vmem:[#allocation4 + $0x28] sm:$0xff] }
  0x3b   :  { %2922 = vmatpush3.msra.mxu0 %v3663_v8  ;;  %2933 = vmatpush3.msra.mxu1 %v3665_v9  ;;  %p3510_p10 = pnand %p3509_p9, %p3503_p6 }
  0x3c   :  { %2937 = vmatprep.subr.mxu0 %v3578_v0  ;;  %2948 = vmatprep.subr.mxu1 %v3578_v0  ;;  %v101_v12 = vld [vmem:[#allocation2] sm:$0xff] }
  0x3d   :  { %2924 = vmatmul.mubr.msk.f32.vlgmr.msra.gmra.mxu0 %vm78_vm1, %v101_v12  ;;  %2935 = vmatmul.mubr.msk.f32.vlgmr.msra.gmra.mxu1 %vm78_vm1, %v101_v12 }
  0x3e   :  { %2938 = vmatpush3.msra.mxu0 %v3675_v10  ;;  %2949 = vmatpush3.msra.mxu1 %v3677_v11 }
  0x3f   :  { %2939 = vmatprep.subr.mxu0 %v3578_v0  ;;  %2950 = vmatprep.subr.mxu1 %v3578_v0 }
  0x40   :  { %2940 = vmatpush3.msra.mxu0 %v3681_v13  ;;  %2951 = vmatpush3.msra.mxu1 %v3683_v14  ;;  %v102_v45 = vld [vmem:[#allocation3] sm:$0xff] }
  0x41   :  { %2941 = vmatprep.subr.mxu0 %v3578_v0  ;;  %2952 = vmatprep.subr.mxu1 %v3578_v0 }
  0x42   :  { %2942 = vmatpush3.msra.mxu0 %v3689_v15  ;;  %2953 = vmatpush3.msra.mxu1 %v3691_v16 }
  0x43   :  { %2943 = vmatprep.subr.mxu0 %v3578_v0  ;;  %2954 = vmatprep.subr.mxu1 %v3578_v0 }
  0x44   :  { %2944 = vmatpush3.msra.mxu0 %v3697_v17  ;;  %2945 = vmatprep.mubr.msk.f32.mxu0 %vm3579_vm0, %v3578_v0 }
  0x45   :  { %2955 = vmatpush3.msra.mxu1 %v3701_v18  ;;  %2956 = vmatprep.mubr.msk.f32.mxu1 %vm3579_vm0, %v3578_v0 }
  0x46   :  { %2946 = vmatmul.mubr.msk.f32.vlgmr.msra.gmra.mxu0 %vm78_vm1, %v101_v12  ;;  %2957 = vmatmul.mubr.msk.f32.vlgmr.msra.gmra.mxu1 %vm78_vm1, %v101_v12  ;;  %v424_v12 = vld [vmem:[#allocation4 + $0x38] sm:$0xff] }
  0x47   :  { %2959 = vmatprep.subr.mxu0 %v3578_v0  ;;  %2970 = vmatprep.subr.mxu1 %v3578_v0 }
  0x48   :  { %2960 = vmatpush3.msra.mxu0 %v3642_v1  ;;  %2971 = vmatpush3.msra.mxu1 %v3644_v2 }
  0x49   :  { %2961 = vmatprep.subr.mxu0 %v3578_v0  ;;  %2972 = vmatprep.subr.mxu1 %v3578_v0 }
  0x4a   :  { %2962 = vmatpush3.msra.mxu0 %v3646_v3  ;;  %2973 = vmatpush3.msra.mxu1 %v3650_v4 }
  0x4b   :  { %2963 = vmatprep.subr.mxu0 %v3578_v0  ;;  %2974 = vmatprep.subr.mxu1 %v3578_v0 }
  0x4c   :  { %2964 = vmatpush3.msra.mxu0 %v3654_v5  ;;  %2975 = vmatpush3.msra.mxu1 %v3656_v6 }
  0x4d   :  { %2965 = vmatprep.subr.mxu0 %v3578_v0  ;;  %2976 = vmatprep.subr.mxu1 %v3578_v0 }
  0x4e   :  { %2966 = vmatpush3.msra.mxu0 %v3663_v8  ;;  %2977 = vmatpush3.msra.mxu1 %v3665_v9 }
  0x4f   :  { %2967 = vmatprep.mubr.msk.f32.mxu0 %vm3579_vm0, %v3578_v0  ;;  %2978 = vmatprep.mubr.msk.f32.mxu1 %vm3579_vm0, %v3578_v0 }
  0x50   :  { %2981 = vmatprep.subr.mxu0 %v3578_v0  ;;  %2992 = vmatprep.subr.mxu1 %v3578_v0 }
  0xfd   :  { %v177_v22 = vpop.f32.mrf.mxu0  ;;  %v248_v23 = vpop.f32.mrf.mxu1 }
  0xfe   :  { %v181_v24 = vadd.f32 %v177_v22, %v103_v20  ;;  %v252_v25 = vadd.f32 %v248_v23, %v104_v21 }
  0xff   :  { %v2925_v26 = vpop.f32.mrf.mxu0  ;;  %v2936_v27 = vpop.f32.mrf.mxu1 }
 0x100   :  { %v2703_v28 = vmul.f32 -1.442695, %v181_v24  ;;  %v2704_v29 = vmul.f32 -1.442695, %v252_v25  ;;  %v423_v24 = vld [vmem:[#allocation4 + $0x30] sm:$0xff] }
 0x102   :  { %3278 = vpow2.f32 %v2703_v28 }
 0x103   :  { %3280 = vpow2.f32 %v2704_v29 }
 0x106   :  { %v319_v31 = vpop.f32.mrf.mxu0  ;;  %v390_v32 = vpop.f32.mrf.mxu1 }
 0x107   :  { %v394_v33 = vadd.f32 %v390_v32, %v106_v30  ;;  %v323_v38 = vadd.f32 %v319_v31, %v105_v36 }
 0x108   :  { %v2947_v34 = vpop.f32.mrf.mxu0  ;;  %v2958_v35 = vpop.f32.mrf.mxu1 }
 0x109   :  { %v2705_v37 = vmul.f32 -1.442695, %v394_v33 }
 0x10b   :  { %3282 = vpow2.f32 %v2705_v37 }
 0x10c   :  { %3284 = vtanh.f32 %v323_v38 }
 0x10f   :  { %v3279_v39 = vpop.eup %3278 }
 0x110   :  { %v3281_v40 = vpop.eup %3280  ;;  %v398_v41 = vadd.f32 1.0, %v3279_v39 }
 0x111   :  { %v404_v42 = vadd.f32 1.0, %v3281_v40 }
 0x112   :  { %3286 = vrcp.f32 %v398_v41 }
 0x113   :  { %3288 = vrcp.f32 %v404_v42  ;;  %v739_v42 = vld [vmem:[#allocation4 + $0x40] sm:$0xff] }
 0x118   :  { %v3283_v43 = vpop.eup %3282 }
 0x119   :  { %v3285_v44 = vpop.eup %3284  ;;  %v411_v47 = vadd.f32 1.0, %v3283_v43  ;;  %v740_v43 = vld [vmem:[#allocation4 + $0x48] sm:$0xff] }
 0x11b   :  { %3290 = vrcp.f32 %v411_v47 }
 0x11f   :  { %v3287_v46 = vpop.eup %3286 }
 0x120   :  { %v3289_v48 = vpop.eup %3288  ;;  %v415_v49 = vmul.f32 %v3287_v46, %v3285_v44 }
 0x121   :  { %v414_v50 = vmul.f32 %v3289_v48, %v102_v45 }
 0x123   :  { %v3736_v51 = vadd.f32 %v415_v49, %v414_v50 }
 0x125   :  { %3292 = vtanh.f32 %v3736_v51 }
 0x128   :  { %v3291_v52 = vpop.eup %3290 }
 0x132   :  { %v3293_v53 = vpop.eup %3292 }
 0x133   :  { %v418_v54 = vmul.f32 %v3293_v53, %v3291_v52  ;;  %v742_v52 = vld [vmem:[#allocation4 + $0x58] sm:$0xff] }
 0x135   :  { %2968 = vmatmul.mubr.msk.f32.vlgmr.msra.gmra.mxu0 %vm78_vm1, %v418_v54  ;;  %419 = vst.msk [vmem:[#allocation12] sm:$0xff] %vm78_vm1, %v418_v54  ;;  %2979 = vmatmul.mubr.msk.f32.vlgmr.msra.gmra.mxu1 %vm78_vm1, %v418_v54 }
 0x136   :  { %2982 = vmatpush3.msra.mxu0 %v3675_v10  ;;  %2993 = vmatpush3.msra.mxu1 %v3677_v11 }
 0x137   :  { %2983 = vmatprep.subr.mxu0 %v3578_v0  ;;  %2994 = vmatprep.subr.mxu1 %v3578_v0 }
 0x138   :  { %2984 = vmatpush3.msra.mxu0 %v3681_v13  ;;  %2995 = vmatpush3.msra.mxu1 %v3683_v14 }
 0x139   :  { %2985 = vmatprep.subr.mxu0 %v3578_v0  ;;  %2996 = vmatprep.subr.mxu1 %v3578_v0 }
 0x13a   :  { %2986 = vmatpush3.msra.mxu0 %v3689_v15  ;;  %2997 = vmatpush3.msra.mxu1 %v3691_v16 }
 0x13b   :  { %2987 = vmatprep.subr.mxu0 %v3578_v0  ;;  %2998 = vmatprep.subr.mxu1 %v3578_v0 }
 0x13c   :  { %2988 = vmatpush3.msra.mxu0 %v3697_v17  ;;  %2989 = vmatprep.mubr.msk.f32.mxu0 %vm3579_vm0, %v3578_v0 }
 0x13d   :  { %2999 = vmatpush3.msra.mxu1 %v3701_v18  ;;  %3000 = vmatprep.mubr.msk.f32.mxu1 %vm3579_vm0, %v3578_v0 }
 0x13e   :  { %2990 = vmatmul.mubr.msk.f32.vlgmr.msra.gmra.mxu0 %vm78_vm1, %v418_v54  ;;  %3001 = vmatmul.mubr.msk.f32.vlgmr.msra.gmra.mxu1 %vm78_vm1, %v418_v54 }
 0x13f   :  { %3003 = vmatprep.subr.mxu0 %v3578_v0  ;;  %3014 = vmatprep.subr.mxu1 %v3578_v0 }
 0x140   :  { %3004 = vmatpush3.msra.mxu0 %v3642_v1  ;;  %3015 = vmatpush3.msra.mxu1 %v3644_v2 }
 0x141   :  { %3005 = vmatprep.subr.mxu0 %v3578_v0  ;;  %3016 = vmatprep.subr.mxu1 %v3578_v0 }
 0x142   :  { %3006 = vmatpush3.msra.mxu0 %v3646_v3  ;;  %3017 = vmatpush3.msra.mxu1 %v3650_v4 }
 0x143   :  { %3007 = vmatprep.subr.mxu0 %v3578_v0  ;;  %3018 = vmatprep.subr.mxu1 %v3578_v0 }
 0x144   :  { %3008 = vmatpush3.msra.mxu0 %v3654_v5  ;;  %3019 = vmatpush3.msra.mxu1 %v3656_v6 }
 0x145   :  { %3009 = vmatprep.subr.mxu0 %v3578_v0  ;;  %3020 = vmatprep.subr.mxu1 %v3578_v0 }
 0x146   :  { %3010 = vmatpush3.msra.mxu0 %v3663_v8  ;;  %3021 = vmatpush3.msra.mxu1 %v3665_v9 }
 0x147   :  { %3011 = vmatprep.mubr.msk.f32.mxu0 %vm3579_vm0, %v3578_v0  ;;  %3022 = vmatprep.mubr.msk.f32.mxu1 %vm3579_vm0, %v3578_v0 }
 0x148   :  { %3025 = vmatprep.subr.mxu0 %v3578_v0  ;;  %3036 = vmatprep.subr.mxu1 %v3578_v0 }
 0x1f5   :  { %v494_v57 = vpop.f32.mrf.mxu0  ;;  %v565_v58 = vpop.f32.mrf.mxu1 }
 0x1f6   :  { %v498_v59 = vadd.f32 %v494_v57, %v421_v55  ;;  %v569_v60 = vadd.f32 %v565_v58, %v422_v56  ;;  %v741_v58 = vld [vmem:[#allocation4 + $0x50] sm:$0xff] }
 0x1f7   :  { %v2969_v61 = vpop.f32.mrf.mxu0  ;;  %v2980_v62 = vpop.f32.mrf.mxu1 }
 0x1f8   :  { %v2710_v63 = vmul.f32 -1.442695, %v498_v59  ;;  %v2711_v7 = vmul.f32 -1.442695, %v569_v60 }
 0x1fa   :  { %3294 = vpow2.f32 %v2710_v63 }
 0x1fb   :  { %3296 = vpow2.f32 %v2711_v7 }
 0x1fe   :  { %v636_v19 = vpop.f32.mrf.mxu0  ;;  %v707_v20 = vpop.f32.mrf.mxu1 }
 0x1ff   :  { %v711_v21 = vadd.f32 %v707_v20, %v424_v12  ;;  %v640_v26 = vadd.f32 %v636_v19, %v423_v24 }
 0x200   :  { %v2991_v22 = vpop.f32.mrf.mxu0  ;;  %v3002_v23 = vpop.f32.mrf.mxu1 }
 0x201   :  { %v2712_v25 = vmul.f32 -1.442695, %v711_v21 }
 0x203   :  { %3298 = vpow2.f32 %v2712_v25 }
 0x204   :  { %3300 = vtanh.f32 %v640_v26 }
 0x207   :  { %v3295_v27 = vpop.eup %3294 }
 0x208   :  { %v3297_v28 = vpop.eup %3296  ;;  %v715_v29 = vadd.f32 1.0, %v3295_v27 }
 0x209   :  { %v721_v30 = vadd.f32 1.0, %v3297_v28 }
 0x20a   :  { %3302 = vrcp.f32 %v715_v29  ;;  %v1057_v29 = vld [vmem:[#allocation4 + $0x60] sm:$0xff] }
 0x20b   :  { %3304 = vrcp.f32 %v721_v30  ;;  %v1058_v30 = vld [vmem:[#allocation4 + $0x68] sm:$0xff] }
 0x210   :  { %v3299_v31 = vpop.eup %3298 }
 0x211   :  { %v3301_v32 = vpop.eup %3300  ;;  %v728_v36 = vadd.f32 1.0, %v3299_v31 }
 0x213   :  { %3306 = vrcp.f32 %v728_v36 }
 0x217   :  { %v3303_v33 = vpop.eup %3302 }
 0x218   :  { %v3305_v34 = vpop.eup %3304  ;;  %v732_v35 = vmul.f32 %v3303_v33, %v3301_v32 }
 0x219   :  { %v731_v37 = vmul.f32 %v3305_v34, %v3736_v51 }
 0x21b   :  { %v3785_v38 = vadd.f32 %v732_v35, %v731_v37 }
 0x21d   :  { %3308 = vtanh.f32 %v3785_v38 }
 0x220   :  { %v3307_v39 = vpop.eup %3306 }
 0x22a   :  { %v3309_v40 = vpop.eup %3308 }
 0x22b   :  { %v735_v41 = vmul.f32 %v3309_v40, %v3307_v39  ;;  %v1060_v39 = vld [vmem:[#allocation4 + $0x78] sm:$0xff] }
 0x22d   :  { %3012 = vmatmul.mubr.msk.f32.vlgmr.msra.gmra.mxu0 %vm78_vm1, %v735_v41  ;;  %737 = vst.msk [vmem:[#allocation12 + $0x8] sm:$0xff] %vm78_vm1, %v735_v41  ;;  %3023 = vmatmul.mubr.msk.f32.vlgmr.msra.gmra.mxu1 %vm78_vm1, %v735_v41 }
 0x22e   :  { %3026 = vmatpush3.msra.mxu0 %v3675_v10  ;;  %3037 = vmatpush3.msra.mxu1 %v3677_v11 }
 0x22f   :  { %3027 = vmatprep.subr.mxu0 %v3578_v0  ;;  %3038 = vmatprep.subr.mxu1 %v3578_v0 }
 0x230   :  { %3028 = vmatpush3.msra.mxu0 %v3681_v13  ;;  %3039 = vmatpush3.msra.mxu1 %v3683_v14 }
 0x231   :  { %3029 = vmatprep.subr.mxu0 %v3578_v0  ;;  %3040 = vmatprep.subr.mxu1 %v3578_v0 }
 0x232   :  { %3030 = vmatpush3.msra.mxu0 %v3689_v15  ;;  %3041 = vmatpush3.msra.mxu1 %v3691_v16 }
 0x233   :  { %3031 = vmatprep.subr.mxu0 %v3578_v0  ;;  %3042 = vmatprep.subr.mxu1 %v3578_v0 }
 0x234   :  { %3032 = vmatpush3.msra.mxu0 %v3697_v17  ;;  %3033 = vmatprep.mubr.msk.f32.mxu0 %vm3579_vm0, %v3578_v0 }
 0x235   :  { %3043 = vmatpush3.msra.mxu1 %v3701_v18  ;;  %3044 = vmatprep.mubr.msk.f32.mxu1 %vm3579_vm0, %v3578_v0 }
 0x236   :  { %3034 = vmatmul.mubr.msk.f32.vlgmr.msra.gmra.mxu0 %vm78_vm1, %v735_v41  ;;  %3045 = vmatmul.mubr.msk.f32.vlgmr.msra.gmra.mxu1 %vm78_vm1, %v735_v41 }
 0x237   :  { %3047 = vmatprep.subr.mxu0 %v3578_v0  ;;  %3058 = vmatprep.subr.mxu1 %v3578_v0 }
 0x238   :  { %3048 = vmatpush3.msra.mxu0 %v3642_v1  ;;  %3059 = vmatpush3.msra.mxu1 %v3644_v2 }
 0x239   :  { %3049 = vmatprep.subr.mxu0 %v3578_v0  ;;  %3060 = vmatprep.subr.mxu1 %v3578_v0 }
 0x23a   :  { %3050 = vmatpush3.msra.mxu0 %v3646_v3  ;;  %3061 = vmatpush3.msra.mxu1 %v3650_v4 }
 0x23b   :  { %3051 = vmatprep.subr.mxu0 %v3578_v0  ;;  %3062 = vmatprep.subr.mxu1 %v3578_v0 }
 0x23c   :  { %3052 = vmatpush3.msra.mxu0 %v3654_v5  ;;  %3063 = vmatpush3.msra.mxu1 %v3656_v6 }
 0x23d   :  { %3053 = vmatprep.subr.mxu0 %v3578_v0  ;;  %3064 = vmatprep.subr.mxu1 %v3578_v0 }
 0x23e   :  { %3054 = vmatpush3.msra.mxu0 %v3663_v8  ;;  %3065 = vmatpush3.msra.mxu1 %v3665_v9 }
 0x23f   :  { %3055 = vmatprep.mubr.msk.f32.mxu0 %vm3579_vm0, %v3578_v0  ;;  %3066 = vmatprep.mubr.msk.f32.mxu1 %vm3579_vm0, %v3578_v0 }
 0x240   :  { %3069 = vmatprep.subr.mxu0 %v3578_v0  ;;  %3080 = vmatprep.subr.mxu1 %v3578_v0 }
 0x2ed   :  { %v812_v44 = vpop.f32.mrf.mxu0  ;;  %v883_v45 = vpop.f32.mrf.mxu1 }
 0x2ee   :  { %v816_v46 = vadd.f32 %v812_v44, %v739_v42  ;;  %v887_v47 = vadd.f32 %v883_v45, %v740_v43  ;;  %v1059_v45 = vld [vmem:[#allocation4 + $0x70] sm:$0xff] }
 0x2ef   :  { %v3013_v48 = vpop.f32.mrf.mxu0  ;;  %v3024_v49 = vpop.f32.mrf.mxu1 }
 0x2f0   :  { %v2717_v50 = vmul.f32 -1.442695, %v816_v46  ;;  %v2718_v51 = vmul.f32 -1.442695, %v887_v47 }
 0x2f2   :  { %3310 = vpow2.f32 %v2717_v50 }
 0x2f3   :  { %3312 = vpow2.f32 %v2718_v51 }
 0x2f6   :  { %v954_v53 = vpop.f32.mrf.mxu0  ;;  %v1025_v54 = vpop.f32.mrf.mxu1 }
 0x2f7   :  { %v1029_v55 = vadd.f32 %v1025_v54, %v742_v52  ;;  %v958_v60 = vadd.f32 %v954_v53, %v741_v58 }
 0x2f8   :  { %v3035_v56 = vpop.f32.mrf.mxu0  ;;  %v3046_v57 = vpop.f32.mrf.mxu1 }
 0x2f9   :  { %v2719_v59 = vmul.f32 -1.442695, %v1029_v55 }
 0x2fb   :  { %3314 = vpow2.f32 %v2719_v59 }
 0x2fc   :  { %3316 = vtanh.f32 %v958_v60 }
 0x2ff   :  { %v3311_v61 = vpop.eup %3310 }
 0x300   :  { %v3313_v62 = vpop.eup %3312  ;;  %v1033_v63 = vadd.f32 1.0, %v3311_v61 }
 0x301   :  { %v1039_v7 = vadd.f32 1.0, %v3313_v62 }
 0x302   :  { %3318 = vrcp.f32 %v1033_v63  ;;  %v1375_v63 = vld [vmem:[#allocation4 + $0x80] sm:$0xff] }
 0x303   :  { %3320 = vrcp.f32 %v1039_v7  ;;  %v1376_v7 = vld [vmem:[#allocation4 + $0x88] sm:$0xff] }
 0x308   :  { %v3315_v12 = vpop.eup %3314 }
 0x309   :  { %v3317_v19 = vpop.eup %3316  ;;  %v1046_v23 = vadd.f32 1.0, %v3315_v12 }
 0x30b   :  { %3322 = vrcp.f32 %v1046_v23 }
 0x30f   :  { %v3319_v20 = vpop.eup %3318 }
 0x310   :  { %v3321_v21 = vpop.eup %3320  ;;  %v1050_v22 = vmul.f32 %v3319_v20, %v3317_v19 }
 0x311   :  { %v1049_v24 = vmul.f32 %v3321_v21, %v3785_v38 }
 0x313   :  { %v3834_v25 = vadd.f32 %v1050_v22, %v1049_v24 }
 0x315   :  { %3324 = vtanh.f32 %v3834_v25 }
 0x318   :  { %v3323_v26 = vpop.eup %3322 }
 0x322   :  { %v3325_v27 = vpop.eup %3324 }
 0x323   :  { %v1053_v28 = vmul.f32 %v3325_v27, %v3323_v26  ;;  %v1378_v26 = vld [vmem:[#allocation4 + $0x98] sm:$0xff] }
 0x325   :  { %3056 = vmatmul.mubr.msk.f32.vlgmr.msra.gmra.mxu0 %vm78_vm1, %v1053_v28  ;;  %1055 = vst.msk [vmem:[#allocation12 + $0x10] sm:$0xff] %vm78_vm1, %v1053_v28  ;;  %3067 = vmatmul.mubr.msk.f32.vlgmr.msra.gmra.mxu1 %vm78_vm1, %v1053_v28 }
 0x326   :  { %3070 = vmatpush3.msra.mxu0 %v3675_v10  ;;  %3081 = vmatpush3.msra.mxu1 %v3677_v11 }
 0x327   :  { %3071 = vmatprep.subr.mxu0 %v3578_v0  ;;  %3082 = vmatprep.subr.mxu1 %v3578_v0 }
 0x328   :  { %3072 = vmatpush3.msra.mxu0 %v3681_v13  ;;  %3083 = vmatpush3.msra.mxu1 %v3683_v14 }
 0x329   :  { %3073 = vmatprep.subr.mxu0 %v3578_v0  ;;  %3084 = vmatprep.subr.mxu1 %v3578_v0 }
 0x32a   :  { %3074 = vmatpush3.msra.mxu0 %v3689_v15  ;;  %3085 = vmatpush3.msra.mxu1 %v3691_v16 }
 0x32b   :  { %3075 = vmatprep.subr.mxu0 %v3578_v0  ;;  %3086 = vmatprep.subr.mxu1 %v3578_v0 }
 0x32c   :  { %3076 = vmatpush3.msra.mxu0 %v3697_v17  ;;  %3077 = vmatprep.mubr.msk.f32.mxu0 %vm3579_vm0, %v3578_v0 }
 0x32d   :  { %3087 = vmatpush3.msra.mxu1 %v3701_v18  ;;  %3088 = vmatprep.mubr.msk.f32.mxu1 %vm3579_vm0, %v3578_v0 }
 0x32e   :  { %3078 = vmatmul.mubr.msk.f32.vlgmr.msra.gmra.mxu0 %vm78_vm1, %v1053_v28  ;;  %3089 = vmatmul.mubr.msk.f32.vlgmr.msra.gmra.mxu1 %vm78_vm1, %v1053_v28 }
 0x32f   :  { %3091 = vmatprep.subr.mxu0 %v3578_v0  ;;  %3102 = vmatprep.subr.mxu1 %v3578_v0 }
 0x330   :  { %3092 = vmatpush3.msra.mxu0 %v3642_v1  ;;  %3103 = vmatpush3.msra.mxu1 %v3644_v2 }
 0x331   :  { %3093 = vmatprep.subr.mxu0 %v3578_v0  ;;  %3104 = vmatprep.subr.mxu1 %v3578_v0 }
 0x332   :  { %3094 = vmatpush3.msra.mxu0 %v3646_v3  ;;  %3105 = vmatpush3.msra.mxu1 %v3650_v4 }
 0x333   :  { %3095 = vmatprep.subr.mxu0 %v3578_v0  ;;  %3106 = vmatprep.subr.mxu1 %v3578_v0 }
 0x334   :  { %3096 = vmatpush3.msra.mxu0 %v3654_v5  ;;  %3107 = vmatpush3.msra.mxu1 %v3656_v6 }
 0x335   :  { %3097 = vmatprep.subr.mxu0 %v3578_v0  ;;  %3108 = vmatprep.subr.mxu1 %v3578_v0 }
 0x336   :  { %3098 = vmatpush3.msra.mxu0 %v3663_v8  ;;  %3109 = vmatpush3.msra.mxu1 %v3665_v9 }
 0x337   :  { %3099 = vmatprep.mubr.msk.f32.mxu0 %vm3579_vm0, %v3578_v0  ;;  %3110 = vmatprep.mubr.msk.f32.mxu1 %vm3579_vm0, %v3578_v0 }
 0x338   :  { %3113 = vmatprep.subr.mxu0 %v3578_v0  ;;  %3124 = vmatprep.subr.mxu1 %v3578_v0 }
 0x3e5   :  { %v1130_v31 = vpop.f32.mrf.mxu0  ;;  %v1201_v32 = vpop.f32.mrf.mxu1 }
 0x3e6   :  { %v1134_v33 = vadd.f32 %v1130_v31, %v1057_v29  ;;  %v1205_v34 = vadd.f32 %v1201_v32, %v1058_v30  ;;  %v1377_v32 = vld [vmem:[#allocation4 + $0x90] sm:$0xff] }
 0x3e7   :  { %v3057_v35 = vpop.f32.mrf.mxu0  ;;  %v3068_v36 = vpop.f32.mrf.mxu1 }
 0x3e8   :  { %v2724_v37 = vmul.f32 -1.442695, %v1134_v33  ;;  %v2725_v38 = vmul.f32 -1.442695, %v1205_v34 }
 0x3ea   :  { %3326 = vpow2.f32 %v2724_v37 }
 0x3eb   :  { %3328 = vpow2.f32 %v2725_v38 }
 0x3ee   :  { %v1272_v40 = vpop.f32.mrf.mxu0  ;;  %v1343_v41 = vpop.f32.mrf.mxu1 }
 0x3ef   :  { %v1347_v42 = vadd.f32 %v1343_v41, %v1060_v39  ;;  %v1276_v47 = vadd.f32 %v1272_v40, %v1059_v45 }
 0x3f0   :  { %v3079_v43 = vpop.f32.mrf.mxu0  ;;  %v3090_v44 = vpop.f32.mrf.mxu1 }
 0x3f1   :  { %v2726_v46 = vmul.f32 -1.442695, %v1347_v42 }
 0x3f3   :  { %3330 = vpow2.f32 %v2726_v46 }
 0x3f4   :  { %3332 = vtanh.f32 %v1276_v47 }
 0x3f7   :  { %v3327_v48 = vpop.eup %3326 }
 0x3f8   :  { %v3329_v49 = vpop.eup %3328  ;;  %v1351_v50 = vadd.f32 1.0, %v3327_v48 }
 0x3f9   :  { %v1357_v51 = vadd.f32 1.0, %v3329_v49 }
 0x3fa   :  { %3334 = vrcp.f32 %v1351_v50  ;;  %v1696_v50 = vld [vmem:[#allocation4 + $0xb8] sm:$0xff] }
 0x3fb   :  { %3336 = vrcp.f32 %v1357_v51 }
 0x400   :  { %v3331_v52 = vpop.eup %3330 }
 0x401   :  { %v3333_v53 = vpop.eup %3332  ;;  %v1364_v57 = vadd.f32 1.0, %v3331_v52 }
 0x403   :  { %3338 = vrcp.f32 %v1364_v57 }
 0x407   :  { %v3335_v54 = vpop.eup %3334 }
 0x408   :  { %v3337_v55 = vpop.eup %3336  ;;  %v1368_v56 = vmul.f32 %v3335_v54, %v3333_v53 }
 0x409   :  { %v1367_v58 = vmul.f32 %v3337_v55, %v3834_v25 }
 0x40b   :  { %v3883_v59 = vadd.f32 %v1368_v56, %v1367_v58  ;;  %v1695_v56 = vld [vmem:[#allocation4 + $0xb0] sm:$0xff] }
 0x40d   :  { %3340 = vtanh.f32 %v3883_v59 }
 0x410   :  { %v3339_v60 = vpop.eup %3338 }
 0x41a   :  { %v3341_v61 = vpop.eup %3340 }
 0x41b   :  { %v1371_v62 = vmul.f32 %v3341_v61, %v3339_v60 }
 0x41d   :  { %3100 = vmatmul.mubr.msk.f32.vlgmr.msra.gmra.mxu0 %vm78_vm1, %v1371_v62  ;;  %1373 = vst.msk [vmem:[#allocation12 + $0x18] sm:$0xff] %vm78_vm1, %v1371_v62  ;;  %3111 = vmatmul.mubr.msk.f32.vlgmr.msra.gmra.mxu1 %vm78_vm1, %v1371_v62 }
 0x41e   :  { %3114 = vmatpush3.msra.mxu0 %v3675_v10  ;;  %3125 = vmatpush3.msra.mxu1 %v3677_v11 }
 0x41f   :  { %3115 = vmatprep.subr.mxu0 %v3578_v0  ;;  %3126 = vmatprep.subr.mxu1 %v3578_v0 }
 0x420   :  { %3116 = vmatpush3.msra.mxu0 %v3681_v13  ;;  %3127 = vmatpush3.msra.mxu1 %v3683_v14 }
 0x421   :  { %3117 = vmatprep.subr.mxu0 %v3578_v0  ;;  %3128 = vmatprep.subr.mxu1 %v3578_v0 }
 0x422   :  { %3118 = vmatpush3.msra.mxu0 %v3689_v15  ;;  %3129 = vmatpush3.msra.mxu1 %v3691_v16 }
 0x423   :  { %3119 = vmatprep.subr.mxu0 %v3578_v0  ;;  %3130 = vmatprep.subr.mxu1 %v3578_v0 }
 0x424   :  { %3120 = vmatpush3.msra.mxu0 %v3697_v17  ;;  %3121 = vmatprep.mubr.msk.f32.mxu0 %vm3579_vm0, %v3578_v0 }
 0x425   :  { %3131 = vmatpush3.msra.mxu1 %v3701_v18  ;;  %3132 = vmatprep.mubr.msk.f32.mxu1 %vm3579_vm0, %v3578_v0 }
 0x426   :  { %3122 = vmatmul.mubr.msk.f32.vlgmr.msra.gmra.mxu0 %vm78_vm1, %v1371_v62  ;;  %3133 = vmatmul.mubr.msk.f32.vlgmr.msra.gmra.mxu1 %vm78_vm1, %v1371_v62 }
 0x427   :  { %3135 = vmatprep.subr.mxu0 %v3578_v0  ;;  %3146 = vmatprep.subr.mxu1 %v3578_v0 }
 0x428   :  { %3136 = vmatpush3.msra.mxu0 %v3642_v1  ;;  %3147 = vmatpush3.msra.mxu1 %v3644_v2 }
 0x429   :  { %3137 = vmatprep.subr.mxu0 %v3578_v0  ;;  %3148 = vmatprep.subr.mxu1 %v3578_v0 }
 0x42a   :  { %3138 = vmatpush3.msra.mxu0 %v3646_v3  ;;  %3149 = vmatpush3.msra.mxu1 %v3650_v4 }
 0x42b   :  { %3139 = vmatprep.subr.mxu0 %v3578_v0  ;;  %3150 = vmatprep.subr.mxu1 %v3578_v0 }
 0x42c   :  { %3140 = vmatpush3.msra.mxu0 %v3654_v5  ;;  %3151 = vmatpush3.msra.mxu1 %v3656_v6 }
 0x42d   :  { %3141 = vmatprep.subr.mxu0 %v3578_v0  ;;  %3152 = vmatprep.subr.mxu1 %v3578_v0 }
 0x42e   :  { %3142 = vmatpush3.msra.mxu0 %v3663_v8  ;;  %3153 = vmatpush3.msra.mxu1 %v3665_v9 }
 0x42f   :  { %3143 = vmatprep.mubr.msk.f32.mxu0 %vm3579_vm0, %v3578_v0  ;;  %3154 = vmatprep.mubr.msk.f32.mxu1 %vm3579_vm0, %v3578_v0 }
 0x430   :  { %3157 = vmatprep.subr.mxu0 %v3578_v0  ;;  %3168 = vmatprep.subr.mxu1 %v3578_v0 }
 0x4dd   :  { %v1448_v12 = vpop.f32.mrf.mxu0  ;;  %v1519_v19 = vpop.f32.mrf.mxu1 }
 0x4de   :  { %v1452_v20 = vadd.f32 %v1448_v12, %v1375_v63  ;;  %v1523_v21 = vadd.f32 %v1519_v19, %v1376_v7 }
 0x4df   :  { %v3101_v22 = vpop.f32.mrf.mxu0  ;;  %v3112_v23 = vpop.f32.mrf.mxu1 }
 0x4e0   :  { %v2731_v24 = vmul.f32 -1.442695, %v1452_v20  ;;  %v2732_v25 = vmul.f32 -1.442695, %v1523_v21 }
 0x4e2   :  { %3342 = vpow2.f32 %v2731_v24 }
 0x4e3   :  { %3344 = vpow2.f32 %v2732_v25 }
 0x4e6   :  { %v1590_v27 = vpop.f32.mrf.mxu0  ;;  %v1661_v28 = vpop.f32.mrf.mxu1 }
 0x4e7   :  { %v1665_v29 = vadd.f32 %v1661_v28, %v1378_v26  ;;  %v1594_v34 = vadd.f32 %v1590_v27, %v1377_v32  ;;  %v3987_v27 = vld [vmem:[#allocation7 + $0x58] sm:$0xff]  ;;  %v2012_v32 = vld [vmem:[#allocation4 + $0xc8] sm:$0xff] }
 0x4e8   :  { %v3123_v30 = vpop.f32.mrf.mxu0  ;;  %v3134_v31 = vpop.f32.mrf.mxu1  ;;  %v3990_v28 = vld [vmem:[#allocation7 + $0x78] sm:$0xff] }
 0x4e9   :  { %v2733_v33 = vmul.f32 -1.442695, %v1665_v29  ;;  %v3414_v29 = vld [vmem:[#allocation7] sm:$0xff] }
 0x4ea   :  { %v3415_v30 = vld [vmem:[#allocation7 + $0x20] sm:$0xff] }
 0x4eb   :  { %3346 = vpow2.f32 %v2733_v33  ;;  %v2011_v31 = vld [vmem:[#allocation4 + $0xc0] sm:$0xff] }
 0x4ec   :  { %3348 = vtanh.f32 %v1594_v34 }
 0x4ef   :  { %v3343_v35 = vpop.eup %3342 }
 0x4f0   :  { %v3345_v36 = vpop.eup %3344  ;;  %v1669_v37 = vadd.f32 1.0, %v3343_v35 }
 0x4f1   :  { %v1675_v38 = vadd.f32 1.0, %v3345_v36 }
 0x4f2   :  { %3350 = vrcp.f32 %v1669_v37 }
 0x4f3   :  { %3352 = vrcp.f32 %v1675_v38 }
 0x4f8   :  { %v3347_v39 = vpop.eup %3346 }
 0x4f9   :  { %v3349_v40 = vpop.eup %3348  ;;  %v1682_v44 = vadd.f32 1.0, %v3347_v39 }
 0x4fb   :  { %3354 = vrcp.f32 %v1682_v44 }
 0x4ff   :  { %v3351_v41 = vpop.eup %3350 }
 0x500   :  { %v3353_v42 = vpop.eup %3352  ;;  %v1686_v43 = vmul.f32 %v3351_v41, %v3349_v40  ;;  %v2014_v41 = vld [vmem:[#allocation4 + $0xd8] sm:$0xff] }
 0x501   :  { %v1685_v45 = vmul.f32 %v3353_v42, %v3883_v59 }
 0x503   :  { %v3932_v46 = vadd.f32 %v1686_v43, %v1685_v45 }
 0x505   :  { %3356 = vtanh.f32 %v3932_v46 }
 0x508   :  { %v3355_v47 = vpop.eup %3354 }
 0x512   :  { %v3357_v48 = vpop.eup %3356 }
 0x513   :  { %v1689_v49 = vmul.f32 %v3357_v48, %v3355_v47  ;;  %v2013_v47 = vld [vmem:[#allocation4 + $0xd0] sm:$0xff] }
 0x515   :  { %3144 = vmatmul.mubr.msk.f32.vlgmr.msra.gmra.mxu0 %vm78_vm1, %v1689_v49  ;;  %1691 = vst.msk [vmem:[#allocation12 + $0x20] sm:$0xff] %vm78_vm1, %v1689_v49  ;;  %3155 = vmatmul.mubr.msk.f32.vlgmr.msra.gmra.mxu1 %vm78_vm1, %v1689_v49 }
 0x516   :  { %3158 = vmatpush3.msra.mxu0 %v3675_v10  ;;  %3169 = vmatpush3.msra.mxu1 %v3677_v11 }
 0x517   :  { %3159 = vmatprep.subr.mxu0 %v3578_v0  ;;  %3170 = vmatprep.subr.mxu1 %v3578_v0 }
 0x518   :  { %3160 = vmatpush3.msra.mxu0 %v3681_v13  ;;  %3171 = vmatpush3.msra.mxu1 %v3683_v14 }
 0x519   :  { %3161 = vmatprep.subr.mxu0 %v3578_v0  ;;  %3172 = vmatprep.subr.mxu1 %v3578_v0 }
 0x51a   :  { %3162 = vmatpush3.msra.mxu0 %v3689_v15  ;;  %3173 = vmatpush3.msra.mxu1 %v3691_v16 }
 0x51b   :  { %3163 = vmatprep.subr.mxu0 %v3578_v0  ;;  %3174 = vmatprep.subr.mxu1 %v3578_v0 }
 0x51c   :  { %3164 = vmatpush3.msra.mxu0 %v3697_v17  ;;  %3165 = vmatprep.mubr.msk.f32.mxu0 %vm3579_vm0, %v3578_v0 }
 0x51d   :  { %3175 = vmatpush3.msra.mxu1 %v3701_v18  ;;  %3176 = vmatprep.mubr.msk.f32.mxu1 %vm3579_vm0, %v3578_v0 }
 0x51e   :  { %3166 = vmatmul.mubr.msk.f32.vlgmr.msra.gmra.mxu0 %vm78_vm1, %v1689_v49  ;;  %3177 = vmatmul.mubr.msk.f32.vlgmr.msra.gmra.mxu1 %vm78_vm1, %v1689_v49 }
 0x51f   :  { %3179 = vmatprep.subr.mxu0 %v3578_v0  ;;  %3190 = vmatprep.subr.mxu1 %v3578_v0 }
 0x520   :  { %3180 = vmatpush3.msra.mxu0 %v3642_v1  ;;  %3191 = vmatpush3.msra.mxu1 %v3644_v2  ;;  %v1693_v1 = vld [vmem:[#allocation4 + $0xa0] sm:$0xff]  ;;  %v1694_v2 = vld [vmem:[#allocation4 + $0xa8] sm:$0xff] }
 0x521   :  { %3181 = vmatprep.subr.mxu0 %v3578_v0  ;;  %3192 = vmatprep.subr.mxu1 %v3578_v0 }
 0x522   :  { %3182 = vmatpush3.msra.mxu0 %v3646_v3  ;;  %3193 = vmatpush3.msra.mxu1 %v3650_v4 }
 0x523   :  { %3183 = vmatprep.subr.mxu0 %v3578_v0  ;;  %3194 = vmatprep.subr.mxu1 %v3578_v0 }
 0x524   :  { %3184 = vmatpush3.msra.mxu0 %v3654_v5  ;;  %3195 = vmatpush3.msra.mxu1 %v3656_v6 }
 0x525   :  { %3185 = vmatprep.subr.mxu0 %v3578_v0  ;;  %3196 = vmatprep.subr.mxu1 %v3578_v0 }
 0x526   :  { %3186 = vmatpush3.msra.mxu0 %v3663_v8  ;;  %3197 = vmatpush3.msra.mxu1 %v3665_v9 }
 0x527   :  { %3187 = vmatprep.mubr.msk.f32.mxu0 %vm3579_vm0, %v3578_v0  ;;  %3198 = vmatprep.mubr.msk.f32.mxu1 %vm3579_vm0, %v3578_v0 }
 0x528   :  { %3201 = vmatprep.subr.mxu0 %v3578_v0  ;;  %3212 = vmatprep.subr.mxu1 %v3578_v0 }
 0x5d5   :  { %v1766_v3 = vpop.f32.mrf.mxu0  ;;  %v1837_v4 = vpop.f32.mrf.mxu1 }
 0x5d6   :  { %v1770_v5 = vadd.f32 %v1766_v3, %v1693_v1  ;;  %v1841_v6 = vadd.f32 %v1837_v4, %v1694_v2 }
 0x5d7   :  { %v3145_v10 = vpop.f32.mrf.mxu0  ;;  %v3156_v8 = vpop.f32.mrf.mxu1 }
 0x5d8   :  { %v2738_v11 = vmul.f32 -1.442695, %v1770_v5  ;;  %v2739_v9 = vmul.f32 -1.442695, %v1841_v6 }
 0x5da   :  { %3358 = vpow2.f32 %v2738_v11 }
 0x5db   :  { %3360 = vpow2.f32 %v2739_v9 }
 0x5de   :  { %v1908_v51 = vpop.f32.mrf.mxu0  ;;  %v1979_v52 = vpop.f32.mrf.mxu1 }
 0x5df   :  { %v1983_v53 = vadd.f32 %v1979_v52, %v1696_v50  ;;  %v1912_v58 = vadd.f32 %v1908_v51, %v1695_v56  ;;  %v3417_v56 = vld [vmem:[#allocation7 + $0x70] sm:$0xff] }
 0x5e0   :  { %v3167_v54 = vpop.f32.mrf.mxu0  ;;  %v3178_v55 = vpop.f32.mrf.mxu1 }
 0x5e1   :  { %v2740_v57 = vmul.f32 -1.442695, %v1983_v53  ;;  %v3416_v55 = vld [vmem:[#allocation7 + $0x50] sm:$0xff] }
 0x5e3   :  { %3362 = vpow2.f32 %v2740_v57  ;;  %v3418_v57 = vld [vmem:[#allocation7 + $0x48] sm:$0xff] }
 0x5e4   :  { %3364 = vtanh.f32 %v1912_v58  ;;  %v3419_v58 = vld [vmem:[#allocation7 + $0x68] sm:$0xff] }
 0x5e7   :  { %v3359_v59 = vpop.eup %3358 }
 0x5e8   :  { %v3361_v60 = vpop.eup %3360  ;;  %v1987_v61 = vadd.f32 1.0, %v3359_v59  ;;  %v3420_v59 = vld [vmem:[#allocation7 + $0x40] sm:$0xff] }
 0x5e9   :  { %v1993_v62 = vadd.f32 1.0, %v3361_v60  ;;  %v3421_v60 = vld [vmem:[#allocation7 + $0x60] sm:$0xff] }
 0x5ea   :  { %3366 = vrcp.f32 %v1987_v61  ;;  %v2329_v61 = vld [vmem:[#allocation4 + $0xe0] sm:$0xff] }
 0x5eb   :  { %3368 = vrcp.f32 %v1993_v62  ;;  %v2330_v62 = vld [vmem:[#allocation4 + $0xe8] sm:$0xff] }
 0x5f0   :  { %v3363_v63 = vpop.eup %3362 }
 0x5f1   :  { %v3365_v7 = vpop.eup %3364  ;;  %v2000_v21 = vadd.f32 1.0, %v3363_v63 }
 0x5f3   :  { %3370 = vrcp.f32 %v2000_v21 }
 0x5f7   :  { %v3367_v12 = vpop.eup %3366 }
 0x5f8   :  { %v3369_v19 = vpop.eup %3368  ;;  %v2004_v20 = vmul.f32 %v3367_v12, %v3365_v7 }
 0x5f9   :  { %v2003_v22 = vmul.f32 %v3369_v19, %v3932_v46 }
 0x5fb   :  { %v3981_v23 = vadd.f32 %v2004_v20, %v2003_v22 }
 0x5fd   :  { %3372 = vtanh.f32 %v3981_v23 }
 0x600   :  { %v3371_v24 = vpop.eup %3370 }
 0x60a   :  { %v3373_v25 = vpop.eup %3372 }
 0x60b   :  { %v2007_v26 = vmul.f32 %v3373_v25, %v3371_v24  ;;  %v2332_v24 = vld [vmem:[#allocation4 + $0xf8] sm:$0xff] }
 0x60d   :  { %3188 = vmatmul.mubr.msk.f32.vlgmr.msra.gmra.mxu0 %vm78_vm1, %v2007_v26  ;;  %2009 = vst.msk [vmem:[#allocation12 + $0x28] sm:$0xff] %vm78_vm1, %v2007_v26  ;;  %3199 = vmatmul.mubr.msk.f32.vlgmr.msra.gmra.mxu1 %vm78_vm1, %v2007_v26 }
 0x60e   :  { %3202 = vmatpush3.msra.mxu0 %v3987_v27  ;;  %3213 = vmatpush3.msra.mxu1 %v3990_v28 }
 0x60f   :  { %3203 = vmatprep.subr.mxu0 %v3578_v0  ;;  %3214 = vmatprep.subr.mxu1 %v3578_v0 }
 0x610   :  { %3204 = vmatpush3.msra.mxu0 %v3681_v13  ;;  %3215 = vmatpush3.msra.mxu1 %v3683_v14  ;;  %v3408_v13 = vld [vmem:[#allocation7 + $0x18] sm:$0xff] }
 0x611   :  { %3205 = vmatprep.subr.mxu0 %v3578_v0  ;;  %3216 = vmatprep.subr.mxu1 %v3578_v0  ;;  %v3409_v14 = vld [vmem:[#allocation7 + $0x38] sm:$0xff] }
 0x612   :  { %3206 = vmatpush3.msra.mxu0 %v3689_v15  ;;  %3217 = vmatpush3.msra.mxu1 %v3691_v16  ;;  %v3410_v15 = vld [vmem:[#allocation7 + $0x10] sm:$0xff] }
 0x613   :  { %3207 = vmatprep.subr.mxu0 %v3578_v0  ;;  %3218 = vmatprep.subr.mxu1 %v3578_v0  ;;  %v3411_v16 = vld [vmem:[#allocation7 + $0x30] sm:$0xff] }
 0x614   :  { %3208 = vmatpush3.msra.mxu0 %v3697_v17  ;;  %3209 = vmatprep.mubr.msk.f32.mxu0 %vm3579_vm0, %v3578_v0  ;;  %v3412_v17 = vld [vmem:[#allocation7 + $0x8] sm:$0xff] }
 0x615   :  { %3219 = vmatpush3.msra.mxu1 %v3701_v18  ;;  %3220 = vmatprep.mubr.msk.f32.mxu1 %vm3579_vm0, %v3578_v0  ;;  %v3413_v18 = vld [vmem:[#allocation7 + $0x28] sm:$0xff] }
 0x616   :  { %3210 = vmatmul.mubr.msk.f32.vlgmr.msra.gmra.mxu0 %vm78_vm1, %v2007_v26  ;;  %3221 = vmatmul.mubr.msk.f32.vlgmr.msra.gmra.mxu1 %vm78_vm1, %v2007_v26 }
 0x617   :  { %3223 = vmatprep.subr.mxu0 %v3578_v0  ;;  %3234 = vmatprep.subr.mxu1 %v3578_v0 }
 0x618   :  { %3224 = vmatpush3.msra.mxu0 %v3408_v13  ;;  %3235 = vmatpush3.msra.mxu1 %v3409_v14  ;;  %v2331_v13 = vld [vmem:[#allocation4 + $0xf0] sm:$0xff] }
 0x619   :  { %3225 = vmatprep.subr.mxu0 %v3578_v0  ;;  %3236 = vmatprep.subr.mxu1 %v3578_v0 }
 0x61a   :  { %3226 = vmatpush3.msra.mxu0 %v3410_v15  ;;  %3237 = vmatpush3.msra.mxu1 %v3411_v16 }
 0x61b   :  { %3227 = vmatprep.subr.mxu0 %v3578_v0  ;;  %3238 = vmatprep.subr.mxu1 %v3578_v0 }
 0x61c   :  { %3228 = vmatpush3.msra.mxu0 %v3412_v17  ;;  %3239 = vmatpush3.msra.mxu1 %v3413_v18 }
 0x61d   :  { %3229 = vmatprep.subr.mxu0 %v3578_v0  ;;  %3240 = vmatprep.subr.mxu1 %v3578_v0 }
 0x61e   :  { %3230 = vmatpush3.msra.mxu0 %v3414_v29  ;;  %3241 = vmatpush3.msra.mxu1 %v3415_v30 }
 0x61f   :  { %3231 = vmatprep.mubr.msk.f32.mxu0 %vm3579_vm0, %v3578_v0  ;;  %3242 = vmatprep.mubr.msk.f32.mxu1 %vm3579_vm0, %v3578_v0 }
 0x620   :  { %3245 = vmatprep.subr.mxu0 %v3578_v0  ;;  %3256 = vmatprep.subr.mxu1 %v3578_v0 }
 0x6cd   :  { %v2084_v33 = vpop.f32.mrf.mxu0  ;;  %v2155_v34 = vpop.f32.mrf.mxu1 }
 0x6ce   :  { %v2088_v35 = vadd.f32 %v2084_v33, %v2011_v31  ;;  %v2159_v36 = vadd.f32 %v2155_v34, %v2012_v32 }
 0x6cf   :  { %v3189_v37 = vpop.f32.mrf.mxu0  ;;  %v3200_v38 = vpop.f32.mrf.mxu1 }
 0x6d0   :  { %v2745_v39 = vmul.f32 -1.442695, %v2088_v35  ;;  %v2746_v40 = vmul.f32 -1.442695, %v2159_v36 }
 0x6d2   :  { %3374 = vpow2.f32 %v2745_v39 }
 0x6d3   :  { %3376 = vpow2.f32 %v2746_v40 }
 0x6d6   :  { %v2226_v42 = vpop.f32.mrf.mxu0  ;;  %v2297_v43 = vpop.f32.mrf.mxu1 }
 0x6d7   :  { %v2301_v44 = vadd.f32 %v2297_v43, %v2014_v41  ;;  %v2230_v49 = vadd.f32 %v2226_v42, %v2013_v47 }
 0x6d8   :  { %v3211_v45 = vpop.f32.mrf.mxu0  ;;  %v3222_v46 = vpop.f32.mrf.mxu1 }
 0x6d9   :  { %v2747_v48 = vmul.f32 -1.442695, %v2301_v44 }
 0x6db   :  { %3378 = vpow2.f32 %v2747_v48 }
 0x6dc   :  { %3380 = vtanh.f32 %v2230_v49 }
 0x6df   :  { %v3375_v1 = vpop.eup %3374 }
 0x6e0   :  { %v3377_v2 = vpop.eup %3376  ;;  %v2305_v3 = vadd.f32 1.0, %v3375_v1 }
 0x6e1   :  { %v2311_v4 = vadd.f32 1.0, %v3377_v2 }
 0x6e2   :  { %3382 = vrcp.f32 %v2305_v3 }
 0x6e3   :  { %3384 = vrcp.f32 %v2311_v4 }
 0x6e8   :  { %v3379_v5 = vpop.eup %3378 }
 0x6e9   :  { %v3381_v6 = vpop.eup %3380  ;;  %v2318_v9 = vadd.f32 1.0, %v3379_v5 }
 0x6eb   :  { %3386 = vrcp.f32 %v2318_v9 }
 0x6ef   :  { %v3383_v10 = vpop.eup %3382 }
 0x6f0   :  { %v3385_v8 = vpop.eup %3384  ;;  %v2322_v11 = vmul.f32 %v3383_v10, %v3381_v6 }
 0x6f1   :  { %v2321_v50 = vmul.f32 %v3385_v8, %v3981_v23 }
 0x6f3   :  { %v4026_v51 = vadd.f32 %v2322_v11, %v2321_v50 }
 0x6f5   :  { %3388 = vtanh.f32 %v4026_v51 }
 0x6f8   :  { %v3387_v52 = vpop.eup %3386 }
 0x702   :  { %v3389_v53 = vpop.eup %3388 }
 0x703   :  { %v2325_v54 = vmul.f32 %v3389_v53, %v3387_v52 }
 0x705   :  { %3232 = vmatmul.mubr.msk.f32.vlgmr.msra.gmra.mxu0 %vm78_vm1, %v2325_v54  ;;  %2327 = vst.msk [vmem:[#allocation12 + $0x30] sm:$0xff] %vm78_vm1, %v2325_v54  ;;  %3243 = vmatmul.mubr.msk.f32.vlgmr.msra.gmra.mxu1 %vm78_vm1, %v2325_v54 }
 0x706   :  { %3246 = vmatpush3.msra.mxu0 %v3987_v27  ;;  %3257 = vmatpush3.msra.mxu1 %v3990_v28 }
 0x707   :  { %3247 = vmatprep.subr.mxu0 %v3578_v0  ;;  %3258 = vmatprep.subr.mxu1 %v3578_v0 }
 0x708   :  { %3248 = vmatpush3.msra.mxu0 %v3416_v55  ;;  %3259 = vmatpush3.msra.mxu1 %v3417_v56 }
 0x709   :  { %3249 = vmatprep.subr.mxu0 %v3578_v0  ;;  %3260 = vmatprep.subr.mxu1 %v3578_v0 }
 0x70a   :  { %3250 = vmatpush3.msra.mxu0 %v3418_v57  ;;  %3261 = vmatpush3.msra.mxu1 %v3419_v58 }
 0x70b   :  { %3251 = vmatprep.subr.mxu0 %v3578_v0  ;;  %3262 = vmatprep.subr.mxu1 %v3578_v0 }
 0x70c   :  { %3252 = vmatpush3.msra.mxu0 %v3420_v59  ;;  %3253 = vmatprep.mubr.msk.f32.mxu0 %vm3579_vm0, %v3578_v0 }
 0x70d   :  { %3263 = vmatpush3.msra.mxu1 %v3421_v60  ;;  %3264 = vmatprep.mubr.msk.f32.mxu1 %vm3579_vm0, %v3578_v0 }
 0x70e   :  { %3254 = vmatmul.mubr.msk.f32.vlgmr.msra.gmra.mxu0 %vm78_vm1, %v2325_v54  ;;  %3265 = vmatmul.mubr.msk.f32.vlgmr.msra.gmra.mxu1 %vm78_vm1, %v2325_v54 }
 0x7c5   :  { %v2402_v63 = vpop.f32.mrf.mxu0  ;;  %v2473_v7 = vpop.f32.mrf.mxu1 }
 0x7c6   :  { %v2406_v12 = vadd.f32 %v2402_v63, %v2329_v61  ;;  %v2477_v19 = vadd.f32 %v2473_v7, %v2330_v62 }
 0x7c7   :  { %v3233_v20 = vpop.f32.mrf.mxu0  ;;  %v3244_v21 = vpop.f32.mrf.mxu1 }
 0x7c8   :  { %v2752_v22 = vmul.f32 -1.442695, %v2406_v12  ;;  %v2753_v23 = vmul.f32 -1.442695, %v2477_v19 }
 0x7ca   :  { %3390 = vpow2.f32 %v2752_v22 }
 0x7cb   :  { %3392 = vpow2.f32 %v2753_v23 }
 0x7ce   :  { %v2544_v25 = vpop.f32.mrf.mxu0  ;;  %v2615_v26 = vpop.f32.mrf.mxu1 }
 0x7cf   :  { %v2619_v0 = vadd.f32 %v2615_v26, %v2332_v24  ;;  %v2548_v15 = vadd.f32 %v2544_v25, %v2331_v13 }
 0x7d0   :  { %v3255_v27 = vpop.f32.mrf.mxu0  ;;  %v3266_v28 = vpop.f32.mrf.mxu1 }
 0x7d1   :  { %v2754_v14 = vmul.f32 -1.442695, %v2619_v0 }
 0x7d3   :  { %3394 = vpow2.f32 %v2754_v14 }
 0x7d4   :  { %3396 = vtanh.f32 %v2548_v15 }
 0x7d7   :  { %v3391_v16 = vpop.eup %3390 }
 0x7d8   :  { %v3393_v17 = vpop.eup %3392  ;;  %v2623_v18 = vadd.f32 1.0, %v3391_v16 }
 0x7d9   :  { %v2629_v29 = vadd.f32 1.0, %v3393_v17 }
 0x7da   :  { %3398 = vrcp.f32 %v2623_v18 }
 0x7db   :  { %3400 = vrcp.f32 %v2629_v29 }
 0x7e0   :  { %v3395_v30 = vpop.eup %3394 }
 0x7e1   :  { %v3397_v31 = vpop.eup %3396  ;;  %v2636_v35 = vadd.f32 1.0, %v3395_v30 }
 0x7e3   :  { %3402 = vrcp.f32 %v2636_v35 }
 0x7e7   :  { %v3399_v32 = vpop.eup %3398 }
 0x7e8   :  { %v3401_v33 = vpop.eup %3400  ;;  %v2640_v34 = vmul.f32 %v3399_v32, %v3397_v31 }
 0x7e9   :  { %v2639_v36 = vmul.f32 %v3401_v33, %v4026_v51 }
 0x7eb   :  { %v2641_v37 = vadd.f32 %v2640_v34, %v2639_v36 }
 0x7ed   :  { %2647 = vst.msk [vmem:[#allocation3] sm:$0xff] %vm78_vm1, %v2641_v37  ;;  %2652 = vst.msk [vmem:[#allocation15] sm:$0xff] %vm78_vm1, %v2641_v37  ;;  %3404 = vtanh.f32 %v2641_v37 }
 0x7f0   :  { %v3403_v38 = vpop.eup %3402 }
 0x7fa   :  { %v3405_v39 = vpop.eup %3404 }
 0x7fb   :  { %v2643_v40 = vmul.f32 %v3405_v39, %v3403_v38 }
 0x7fd   :  { %2645 = vst.msk [vmem:[#allocation12 + $0x38] sm:$0xff] %vm78_vm1, %v2643_v40  ;;  %2646 = vst.msk [vmem:[#allocation2] sm:$0xff] %vm78_vm1, %v2643_v40 }
 0x7fe   :  { %2651 = vst.msk [vmem:[#allocation13] sm:$0xff] %vm78_vm1, %v2643_v40 }
 0x7ff   :  { %3513 = shalt.err (!%p3510_p10)
}
 0x800   :  { %2674 = dma.vmem_to_hbm [thread:$0]  %s2672_s3, 128, %s4069_s5, [#allocation14]  }
 0x801   :  { %s3522_s24 = scalar_lea.vmem %s2659_s18, 1024  ;;  %p3527_p12 = scmp.lt.s32.totalorder %s2659_s18, %s2659_s18 }
 0x802   :  { %p3523_p11 = scmp.ne.s32.totalorder %s2659_s18, %s3522_s24  ;;  %p3528_p13 = scmp.lt.s32.totalorder %s3522_s24, %s3522_s24 }
 0x804   :  { %p3529_p0 = por %p3528_p13, %p3527_p12 }
 0x806   :  { %p3530_p1 = pnand %p3529_p0, %p3523_p11 }
 0x808   :  { %3533 = shalt.err (!%p3530_p1)
}
 0x809   :  { %2664 = dma.vmem_to_hbm [thread:$0]  %s2659_s18, 1024, %s4068_s4, [#allocation6], %s3574_s26, %s3574_s26, %s3575_s27  }
 0x80a   :  { %s3542_s29 = scalar_lea.vmem %s2682_s20, 128  ;;  %p3547_p3 = scmp.lt.s32.totalorder %s2682_s20, %s2682_s20 }
 0x80b   :  { %p3543_p2 = scmp.ne.s32.totalorder %s2682_s20, %s3542_s29  ;;  %p3548_p4 = scmp.lt.s32.totalorder %s3542_s29, %s3542_s29 }
 0x80d   :  { %p3549_p5 = por %p3548_p4, %p3547_p3 }
 0x80f   :  { %p3550_p6 = pnand %p3549_p5, %p3543_p2 }
 0x811   :  { %3553 = shalt.err (!%p3550_p6)
}
 0x812   :  { %2684 = dma.vmem_to_hbm [thread:$0]  %s2682_s20, 128, %s4070_s6, [#allocation14]  }
 0x813   :  { %3568 = dma.done.wait [#allocation6], 1024  }
 0x814   :  { %3569 = vsyncadd [#allocation6], 4294966272 }
 0x815   :  { %3570 = dma.done.wait [#allocation14], 256  }
 0x816   :  { %3571 = vsyncadd [#allocation14], 4294967040 }
 0x817   :  { %2694 = vsyncpa [#allocation5], 1 }
 0x818   :  { %2695 = vsyncpa [#allocation8], 1 }
 0x819   :  { %2696 = vsyncpa [#allocation11], 1 }
 0x81a   :  { %2697 = vsyncpa [#allocation6], 1 }
 0x81b   :  { %2698 = vsyncpa [#allocation14], 1 }

</bundles_post_ra>
